<compile_context>
chip_gen: v7x
topology: tpu7x:2x2x1
jax: 0.10.0
libtpu: 0.0.40
codegen_flags: <defaults>
</compile_context>

<pallas_src>
import math
import jax
import jax.numpy as jnp
from jax.experimental import pallas as pl
from jax.experimental.pallas import tpu as pltpu

# ---- small synthetic config (hidden % heads == 0, as BertConfig requires) ----
BATCH = 2
SEQ = 8
HIDDEN = 32
NUM_HEADS = 4
HEAD_DIM = HIDDEN // NUM_HEADS
INTERMEDIATE = 64
LN_EPS = 1e-12

# lane-padded widths (everything in-kernel is 128-lane dense)
HP = 128        # padded hidden width
IP = 128        # padded intermediate width
N_VEC = 10      # rows in the packed bias / LayerNorm-parameter slab


def _gelu(x):
    # exact (erf-based) gelu, matching the PyTorch module.
    # TODO(synk): on v5e consider jax.nn.gelu(approximate=True) if VALU-bound.
    return x * 0.5 * (1.0 + jax.lax.erf(x * (1.0 / math.sqrt(2.0))))


def _layernorm_padded(x, gamma, beta, lane_valid):
    # x is (rows, HP) with padded lanes exactly zero -> sums only see real cols.
    mu = jnp.sum(x, axis=-1, keepdims=True) * (1.0 / HIDDEN)
    c = (x - mu) * lane_valid
    var = jnp.sum(c * c, axis=-1, keepdims=True) * (1.0 / HIDDEN)
    # gamma / beta are zero in padded lanes, so padded output lanes stay zero.
    return c * jax.lax.rsqrt(var + LN_EPS) * gamma + beta


def bert_layer_kernel(h_ref, mask_ref, wqkv_ref, wstk_ref, vec_ref, out_ref):
    S, NH, D, H = SEQ, NUM_HEADS, HEAD_DIM, HIDDEN

    h = h_ref[...]                               # (S, HP), padded lanes zero
    m = mask_ref[...]                            # (1, 1, S) additive mask

    # packed bias / LayerNorm-parameter slab (one 128-lane row each)
    bq, bk, bv = vec_ref[0:1, :], vec_ref[1:2, :], vec_ref[2:3, :]
    bao = vec_ref[3:4, :]
    g1, be1 = vec_ref[4:5, :], vec_ref[5:6, :]
    bi = vec_ref[6:7, :]
    bo = vec_ref[7:8, :]
    g2, be2 = vec_ref[8:9, :], vec_ref[9:10, :]

    lane_valid = (jax.lax.broadcasted_iota(jnp.int32, (1, HP), 1)
                  < H).astype(jnp.float32)       # generated in-kernel, no input

    # --- BertSelfAttention: fused Q|K|V projection (single MXU matmul) ---
    # 1/sqrt(head_dim) is pre-folded into the query weight/bias on the host.
    qkv = jnp.dot(h, wqkv_ref[...], preferred_element_type=jnp.float32)  # (S, 3*HP)
    q = qkv[:, 0:HP] + bq
    k = qkv[:, HP:2 * HP] + bk
    v = qkv[:, 2 * HP:3 * HP] + bv

    # Heads as a leading (sublane-batched) axis: (NH, S, D). Contractions run
    # over head_dim only -> no NUM_HEADS-fold redundant MXU work.
    qh = jnp.stack([q[:, i * D:(i + 1) * D] for i in range(NH)], axis=0)
    kh = jnp.stack([k[:, i * D:(i + 1) * D] for i in range(NH)], axis=0)
    vh = jnp.stack([v[:, i * D:(i + 1) * D] for i in range(NH)], axis=0)

    scores = jnp.einsum('hqd,hkd->hqk', qh, kh,
                        preferred_element_type=jnp.float32)       # (NH, S, S)

    # Exact module semantics: scores * (mask >= 0) + mask (additive 0 / -10000).
    gate = (m >= 0.0).astype(jnp.float32)
    scores = scores * gate + m

    # Numerically-stable softmax; exact denominator (review correctness note).
    scores = scores - jnp.max(scores, axis=-1, keepdims=True)
    e = jnp.exp(scores)
    probs = e / jnp.sum(e, axis=-1, keepdims=True)
    # TODO(synk): attention dropout / head_mask / replace_attention not modeled.

    ctx = jnp.einsum('hqk,hkd->hqd', probs, vh,
                     preferred_element_type=jnp.float32)          # (NH, S, D)

    # --- BertSelfOutput: per-head-blocked output projection + residual + LN ---
    wao = wstk_ref[0]                                             # (HP, HP)
    attn = bao
    for i in range(NH):
        attn = attn + jnp.dot(ctx[i], wao[i * D:(i + 1) * D, :],
                              preferred_element_type=jnp.float32)
    x = _layernorm_padded(attn + h, g1, be1, lane_valid)

    # --- BertIntermediate: dense + exact gelu ---
    inter = _gelu(jnp.dot(x, wstk_ref[1], preferred_element_type=jnp.float32) + bi)

    # --- BertOutput: dense + residual + LN (hidden dropout = identity) ---
    out = jnp.dot(inter, wstk_ref[2], preferred_element_type=jnp.float32) + bo
    out_ref[...] = _layernorm_padded(out + x, g2, be2, lane_valid)


def bert_layer(hidden, mask, params):
    B, S, H = hidden.shape
    (wq, bq, wk, bk, wv, bv, wao, bao, g1, be1, wi, bi, wo, bo, g2, be2) = params

    # Fold the constant 1/sqrt(head_dim) attention scale into wq / bq.
    inv_sqrt_d = 1.0 / math.sqrt(HEAD_DIM)
    wq = wq * inv_sqrt_d
    bq = bq * inv_sqrt_d

    def pad2(a, rows, cols):
        out = jnp.zeros((rows, cols), jnp.float32)
        return out.at[:a.shape[0], :a.shape[1]].set(a)

    # Fused QKV weight: each projection zero-padded to its own 128-lane block.
    wqkv = jnp.concatenate(
        [pad2(wq, HP, HP), pad2(wk, HP, HP), pad2(wv, HP, HP)], axis=1)   # (HP, 3*HP)

    # wao / wi / wo stacked into one weight slab (IP == HP == 128 after padding).
    wstk = jnp.stack(
        [pad2(wao, HP, HP), pad2(wi, HP, IP), pad2(wo, IP, HP)], axis=0)  # (3, HP, HP)

    # All (1,H)/(1,I) biases and LN gamma/beta packed into one (N_VEC, 128) slab.
    vec = jnp.stack([
        pad2(bq, 1, HP)[0], pad2(bk, 1, HP)[0], pad2(bv, 1, HP)[0],
        pad2(bao, 1, HP)[0],
        pad2(g1, 1, HP)[0], pad2(be1, 1, HP)[0],
        pad2(bi, 1, IP)[0],
        pad2(bo, 1, HP)[0],
        pad2(g2, 1, HP)[0], pad2(be2, 1, HP)[0]], axis=0)                 # (N_VEC, HP)

    # Lane-dense activations: zero-pad hidden to 128 lanes; padded lanes remain
    # exactly zero through the whole layer and are sliced off at the end.
    h_pad = jnp.zeros((B, S, HP), jnp.float32).at[:, :, :H].set(hidden)
    mask4 = mask.reshape(B, 1, 1, S)          # extended additive-mask layout

    flops = (2 * B * S * HP * 3 * HP                         # fused QKV
             + 2 * 2 * B * NUM_HEADS * S * S * HEAD_DIM      # scores + context
             + 2 * B * S * HIDDEN * HP                       # attn output proj
             + 2 * B * S * HP * IP                           # intermediate
             + 2 * B * S * IP * HP)                          # output
    transcendentals = B * NUM_HEADS * S * S + B * S * IP + 4 * B * S
    bytes_accessed = 4 * (h_pad.size + mask4.size + wqkv.size + wstk.size
                          + vec.size + B * S * HP)

    out_pad = pl.pallas_call(
        bert_layer_kernel,
        out_shape=jax.ShapeDtypeStruct((B, S, HP), jnp.float32),
        grid=(B,),
        in_specs=[
            pl.BlockSpec((None, S, HP), lambda b: (b, 0, 0)),        # hidden
            pl.BlockSpec((None, 1, 1, S), lambda b: (b, 0, 0, 0)),   # mask
            pl.BlockSpec((HP, 3 * HP), lambda b: (0, 0)),            # wqkv (resident)
            pl.BlockSpec((3, HP, HP), lambda b: (0, 0, 0)),          # wao|wi|wo
            pl.BlockSpec((N_VEC, HP), lambda b: (0, 0)),             # bias/LN slab
        ],
        out_specs=pl.BlockSpec((None, S, HP), lambda b: (b, 0, 0)),
        compiler_params=pltpu.CompilerParams(
            dimension_semantics=("parallel",)),                      # v7x: 2 TCs
        cost_estimate=pl.CostEstimate(flops=flops,
                                      transcendentals=transcendentals,
                                      bytes_accessed=bytes_accessed),
    )(h_pad, mask4, wqkv, wstk, vec)

    return out_pad[:, :, :H]


# ---------------------- pure-JAX reference (for checking) -------------------
def _layernorm_ref(x, gamma, beta):
    mu = jnp.mean(x, axis=-1, keepdims=True)
    var = jnp.mean((x - mu) ** 2, axis=-1, keepdims=True)
    return (x - mu) * jax.lax.rsqrt(var + LN_EPS) * gamma + beta


def bert_layer_ref(hidden, mask, params):
    (wq, bq, wk, bk, wv, bv, wao, bao, g1, be1, wi, bi, wo, bo, g2, be2) = params
    B, S, H = hidden.shape

    def one(h, m):
        q = h @ wq + bq[0]
        k = h @ wk + bk[0]
        v = h @ wv + bv[0]
        q = q.reshape(S, NUM_HEADS, HEAD_DIM).transpose(1, 0, 2)
        k = k.reshape(S, NUM_HEADS, HEAD_DIM).transpose(1, 0, 2)
        v = v.reshape(S, NUM_HEADS, HEAD_DIM).transpose(1, 0, 2)
        scores = jnp.einsum('hqd,hkd->hqk', q, k) / math.sqrt(HEAD_DIM)
        scores = scores * (m >= 0).astype(jnp.float32)[None, None, :] + m[None, None, :]
        probs = jax.nn.softmax(scores, axis=-1)
        ctx = jnp.einsum('hqk,hkd->hqd', probs, v).transpose(1, 0, 2).reshape(S, H)
        attn = ctx @ wao + bao[0]
        x = _layernorm_ref(attn + h, g1[0], be1[0])
        inter = _gelu(x @ wi + bi[0])
        out = inter @ wo + bo[0]
        return _layernorm_ref(out + x, g2[0], be2[0])

    return jax.vmap(one)(hidden, mask)


if __name__ == "__main__":
    key = jax.random.PRNGKey(0)
    keys = jax.random.split(key, 12)

    hidden = jax.random.normal(keys[0], (BATCH, SEQ, HIDDEN), dtype=jnp.float32)

    # additive attention mask: batch 0 fully valid, batch 1 last 3 tokens masked
    mask = jnp.zeros((BATCH, SEQ), dtype=jnp.float32)
    mask = mask.at[1, SEQ - 3:].set(-10000.0)

    def lin(k, fan_in, fan_out):
        # weight stored (in, out) so the kernel computes x @ W + b
        w = 0.05 * jax.random.normal(k, (fan_in, fan_out), dtype=jnp.float32)
        b = 0.01 * jax.random.normal(jax.random.fold_in(k, 1), (1, fan_out),
                                     dtype=jnp.float32)
        return w, b

    wq, bq = lin(keys[1], HIDDEN, HIDDEN)
    wk, bk = lin(keys[2], HIDDEN, HIDDEN)
    wv, bv = lin(keys[3], HIDDEN, HIDDEN)
    wao, bao = lin(keys[4], HIDDEN, HIDDEN)
    wi, bi = lin(keys[5], HIDDEN, INTERMEDIATE)
    wo, bo = lin(keys[6], INTERMEDIATE, HIDDEN)
    g1 = jnp.ones((1, HIDDEN), jnp.float32)
    be1 = jnp.zeros((1, HIDDEN), jnp.float32)
    g2 = jnp.ones((1, HIDDEN), jnp.float32)
    be2 = jnp.zeros((1, HIDDEN), jnp.float32)

    params = (wq, bq, wk, bk, wv, bv, wao, bao, g1, be1,
              wi, bi, wo, bo, g2, be2)

    out = bert_layer(hidden, mask, params)
    out = jax.block_until_ready(out)

    ref = bert_layer_ref(hidden, mask, params)
    assert out.shape == (BATCH, SEQ, HIDDEN)
    assert jnp.allclose(out, ref, atol=2e-3, rtol=2e-3), "mismatch vs reference"

    print("KERNEL_OK")
</pallas_src>

<mosaic_0001>
module attributes {stable_mosaic.version = 11 : i64} {
  func.func @bert_layer_kernel(%arg0: i32, %arg1: memref<1x8x128xf32, #tpu.memory_space<vmem>>, %arg2: memref<1x1x1x8xf32, #tpu.memory_space<vmem>>, %arg3: memref<128x384xf32, #tpu.memory_space<vmem>>, %arg4: memref<3x128x128xf32, #tpu.memory_space<vmem>>, %arg5: memref<10x128xf32, #tpu.memory_space<vmem>>, %arg6: memref<1x8x128xf32, #tpu.memory_space<vmem>>) attributes {dimension_semantics = [#tpu.dimension_semantics<parallel>], iteration_bounds = array<i64: 2>, scalar_prefetch = 0 : i64, scratch_operands = 0 : i64, tpu.core_type = #tpu.core_type<tc>, window_params = [{transform_indices = @transform_0, window_bounds = array<i64: 1, 8, 128>}, {transform_indices = @transform_1, window_bounds = array<i64: 1, 1, 1, 8>}, {pipeline_mode = #tpu.pipeline_mode<synchronous>, transform_indices = @transform_2, window_bounds = array<i64: 128, 384>}, {pipeline_mode = #tpu.pipeline_mode<synchronous>, transform_indices = @transform_3, window_bounds = array<i64: 3, 128, 128>}, {pipeline_mode = #tpu.pipeline_mode<synchronous>, transform_indices = @transform_4, window_bounds = array<i64: 10, 128>}, {transform_indices = @transform_5, window_bounds = array<i64: 1, 8, 128>}]} {
    %c0 = arith.constant 0 : index
    %c0_0 = arith.constant 0 : index
    %c0_1 = arith.constant 0 : index
    %0 = vector.load %arg1[%c0, %c0_0, %c0_1] : memref<1x8x128xf32, #tpu.memory_space<vmem>>, vector<1x8x128xf32>
    %1 = vector.shape_cast %0 : vector<1x8x128xf32> to vector<8x128xf32>
    %c0_2 = arith.constant 0 : index
    %c0_3 = arith.constant 0 : index
    %c0_4 = arith.constant 0 : index
    %c0_5 = arith.constant 0 : index
    %2 = vector.load %arg2[%c0_2, %c0_3, %c0_4, %c0_5] : memref<1x1x1x8xf32, #tpu.memory_space<vmem>>, vector<1x1x1x8xf32>
    %3 = vector.shape_cast %2 : vector<1x1x1x8xf32> to vector<1x1x8xf32>
    %c0_6 = arith.constant 0 : index
    %c0_7 = arith.constant 0 : index
    %4 = vector.load %arg5[%c0_6, %c0_7] : memref<10x128xf32, #tpu.memory_space<vmem>>, vector<1x128xf32>
    %c1 = arith.constant 1 : index
    %c0_8 = arith.constant 0 : index
    %5 = vector.load %arg5[%c1, %c0_8] : memref<10x128xf32, #tpu.memory_space<vmem>>, vector<1x128xf32>
    %c2 = arith.constant 2 : index
    %c0_9 = arith.constant 0 : index
    %6 = vector.load %arg5[%c2, %c0_9] : memref<10x128xf32, #tpu.memory_space<vmem>>, vector<1x128xf32>
    %c3 = arith.constant 3 : index
    %c0_10 = arith.constant 0 : index
    %7 = vector.load %arg5[%c3, %c0_10] : memref<10x128xf32, #tpu.memory_space<vmem>>, vector<1x128xf32>
    %c4 = arith.constant 4 : index
    %c0_11 = arith.constant 0 : index
    %8 = vector.load %arg5[%c4, %c0_11] : memref<10x128xf32, #tpu.memory_space<vmem>>, vector<1x128xf32>
    %c5 = arith.constant 5 : index
    %c0_12 = arith.constant 0 : index
    %9 = vector.load %arg5[%c5, %c0_12] : memref<10x128xf32, #tpu.memory_space<vmem>>, vector<1x128xf32>
    %c6 = arith.constant 6 : index
    %c0_13 = arith.constant 0 : index
    %10 = vector.load %arg5[%c6, %c0_13] : memref<10x128xf32, #tpu.memory_space<vmem>>, vector<1x128xf32>
    %c7 = arith.constant 7 : index
    %c0_14 = arith.constant 0 : index
    %11 = vector.load %arg5[%c7, %c0_14] : memref<10x128xf32, #tpu.memory_space<vmem>>, vector<1x128xf32>
    %c8 = arith.constant 8 : index
    %c0_15 = arith.constant 0 : index
    %12 = vector.load %arg5[%c8, %c0_15] : memref<10x128xf32, #tpu.memory_space<vmem>>, vector<1x128xf32>
    %c9 = arith.constant 9 : index
    %c0_16 = arith.constant 0 : index
    %13 = vector.load %arg5[%c9, %c0_16] : memref<10x128xf32, #tpu.memory_space<vmem>>, vector<1x128xf32>
    %14 = tpu.iota {dimensions = array<i32: 1>} : vector<1x128xi32>
    %c32_i32 = arith.constant 32 : i32
    %15 = vector.broadcast %c32_i32 : i32 to vector<1x128xi32>
    %16 = arith.cmpi slt, %14, %15 : vector<1x128xi32>
    %17 = arith.extui %16 : vector<1x128xi1> to vector<1x128xi32>
    %18 = arith.sitofp %17 : vector<1x128xi32> to vector<1x128xf32>
    %c0_17 = arith.constant 0 : index
    %c0_18 = arith.constant 0 : index
    %19 = vector.load %arg3[%c0_17, %c0_18] : memref<128x384xf32, #tpu.memory_space<vmem>>, vector<128x384xf32>
    %cst = arith.constant dense<0.000000e+00> : vector<8x384xf32>
    %20 = tpu.matmul %1, %19, %cst {dimension_numbers = #tpu.dot_dimension_numbers<[1], [0], [0], [1], [0, 0, 1, 1], [], []>} : vector<8x128xf32>, vector<128x384xf32>, vector<8x384xf32> -> vector<8x384xf32>
    %21 = vector.extract_strided_slice %20 {offsets = [0, 0], sizes = [8, 128], strides = [1, 1]} : vector<8x384xf32> to vector<8x128xf32>
    %22 = vector.broadcast %4 : vector<1x128xf32> to vector<8x128xf32>
    %23 = arith.addf %21, %22 : vector<8x128xf32>
    %24 = vector.extract_strided_slice %20 {offsets = [0, 128], sizes = [8, 128], strides = [1, 1]} : vector<8x384xf32> to vector<8x128xf32>
    %25 = vector.broadcast %5 : vector<1x128xf32> to vector<8x128xf32>
    %26 = arith.addf %24, %25 : vector<8x128xf32>
    %27 = vector.extract_strided_slice %20 {offsets = [0, 256], sizes = [8, 128], strides = [1, 1]} : vector<8x384xf32> to vector<8x128xf32>
    %28 = vector.broadcast %6 : vector<1x128xf32> to vector<8x128xf32>
    %29 = arith.addf %27, %28 : vector<8x128xf32>
    %30 = vector.extract_strided_slice %23 {offsets = [0, 0], sizes = [8, 8], strides = [1, 1]} : vector<8x128xf32> to vector<8x8xf32>
    %31 = vector.extract_strided_slice %23 {offsets = [0, 8], sizes = [8, 8], strides = [1, 1]} : vector<8x128xf32> to vector<8x8xf32>
    %32 = vector.extract_strided_slice %23 {offsets = [0, 16], sizes = [8, 8], strides = [1, 1]} : vector<8x128xf32> to vector<8x8xf32>
    %33 = vector.extract_strided_slice %23 {offsets = [0, 24], sizes = [8, 8], strides = [1, 1]} : vector<8x128xf32> to vector<8x8xf32>
    %34 = vector.shape_cast %30 : vector<8x8xf32> to vector<1x8x8xf32>
    %35 = vector.shape_cast %31 : vector<8x8xf32> to vector<1x8x8xf32>
    %36 = vector.shape_cast %32 : vector<8x8xf32> to vector<1x8x8xf32>
    %37 = vector.shape_cast %33 : vector<8x8xf32> to vector<1x8x8xf32>
    %38 = tpu.concatenate %34, %35, %36, %37 in 0 : vector<1x8x8xf32>, vector<1x8x8xf32>, vector<1x8x8xf32>, vector<1x8x8xf32> -> vector<4x8x8xf32>
    %39 = vector.extract_strided_slice %26 {offsets = [0, 0], sizes = [8, 8], strides = [1, 1]} : vector<8x128xf32> to vector<8x8xf32>
    %40 = vector.extract_strided_slice %26 {offsets = [0, 8], sizes = [8, 8], strides = [1, 1]} : vector<8x128xf32> to vector<8x8xf32>
    %41 = vector.extract_strided_slice %26 {offsets = [0, 16], sizes = [8, 8], strides = [1, 1]} : vector<8x128xf32> to vector<8x8xf32>
    %42 = vector.extract_strided_slice %26 {offsets = [0, 24], sizes = [8, 8], strides = [1, 1]} : vector<8x128xf32> to vector<8x8xf32>
    %43 = vector.shape_cast %39 : vector<8x8xf32> to vector<1x8x8xf32>
    %44 = vector.shape_cast %40 : vector<8x8xf32> to vector<1x8x8xf32>
    %45 = vector.shape_cast %41 : vector<8x8xf32> to vector<1x8x8xf32>
    %46 = vector.shape_cast %42 : vector<8x8xf32> to vector<1x8x8xf32>
    %47 = tpu.concatenate %43, %44, %45, %46 in 0 : vector<1x8x8xf32>, vector<1x8x8xf32>, vector<1x8x8xf32>, vector<1x8x8xf32> -> vector<4x8x8xf32>
    %48 = vector.extract_strided_slice %29 {offsets = [0, 0], sizes = [8, 8], strides = [1, 1]} : vector<8x128xf32> to vector<8x8xf32>
    %49 = vector.extract_strided_slice %29 {offsets = [0, 8], sizes = [8, 8], strides = [1, 1]} : vector<8x128xf32> to vector<8x8xf32>
    %50 = vector.extract_strided_slice %29 {offsets = [0, 16], sizes = [8, 8], strides = [1, 1]} : vector<8x128xf32> to vector<8x8xf32>
    %51 = vector.extract_strided_slice %29 {offsets = [0, 24], sizes = [8, 8], strides = [1, 1]} : vector<8x128xf32> to vector<8x8xf32>
    %52 = vector.shape_cast %48 : vector<8x8xf32> to vector<1x8x8xf32>
    %53 = vector.shape_cast %49 : vector<8x8xf32> to vector<1x8x8xf32>
    %54 = vector.shape_cast %50 : vector<8x8xf32> to vector<1x8x8xf32>
    %55 = vector.shape_cast %51 : vector<8x8xf32> to vector<1x8x8xf32>
    %56 = tpu.concatenate %52, %53, %54, %55 in 0 : vector<1x8x8xf32>, vector<1x8x8xf32>, vector<1x8x8xf32>, vector<1x8x8xf32> -> vector<4x8x8xf32>
    "tpu.trace_start"() <{level = 10 : i32, message = "hqd,hkd->hqk"}> : () -> ()
    %cst_19 = arith.constant dense<0.000000e+00> : vector<4x8x8xf32>
    %57 = tpu.matmul %38, %47, %cst_19 {dimension_numbers = #tpu.dot_dimension_numbers<[2], [2], [1], [1], [0, 0, 0, 1, 1, 1], [0], [0]>} : vector<4x8x8xf32>, vector<4x8x8xf32>, vector<4x8x8xf32> -> vector<4x8x8xf32>
    %cst_20 = arith.constant 0.000000e+00 : f32
    "tpu.trace_stop"() : () -> ()
    %58 = vector.broadcast %cst_20 : f32 to vector<1x1x8xf32>
    %59 = arith.cmpf oge, %3, %58 : vector<1x1x8xf32>
    %60 = arith.extui %59 : vector<1x1x8xi1> to vector<1x1x8xi32>
    %61 = arith.sitofp %60 : vector<1x1x8xi32> to vector<1x1x8xf32>
    %62 = vector.broadcast %61 : vector<1x1x8xf32> to vector<4x8x8xf32>
    %63 = arith.mulf %57, %62 : vector<4x8x8xf32>
    %64 = vector.broadcast %3 : vector<1x1x8xf32> to vector<4x8x8xf32>
    %65 = arith.addf %63, %64 : vector<4x8x8xf32>
    %cst_21 = arith.constant dense<0xFF800000> : vector<4x8xf32>
    %66 = vector.multi_reduction <maximumf>, %65, %cst_21 [2] : vector<4x8x8xf32> to vector<4x8xf32>
    %67 = vector.shape_cast %66 : vector<4x8xf32> to vector<4x8x1xf32>
    %68 = vector.broadcast %67 : vector<4x8x1xf32> to vector<4x8x8xf32>
    %69 = arith.subf %65, %68 : vector<4x8x8xf32>
    %70 = math.exp %69 : vector<4x8x8xf32>
    %cst_22 = arith.constant dense<0.000000e+00> : vector<4x8xf32>
    %71 = vector.multi_reduction <add>, %70, %cst_22 [2] : vector<4x8x8xf32> to vector<4x8xf32>
    %72 = vector.shape_cast %71 : vector<4x8xf32> to vector<4x8x1xf32>
    %73 = vector.broadcast %72 : vector<4x8x1xf32> to vector<4x8x8xf32>
    %74 = arith.divf %70, %73 : vector<4x8x8xf32>
    "tpu.trace_start"() <{level = 10 : i32, message = "hqk,hkd->hqd"}> : () -> ()
    %cst_23 = arith.constant dense<0.000000e+00> : vector<4x8x8xf32>
    %75 = tpu.matmul %74, %56, %cst_23 {dimension_numbers = #tpu.dot_dimension_numbers<[2], [1], [1], [2], [0, 0, 0, 1, 1, 2], [0], [0]>} : vector<4x8x8xf32>, vector<4x8x8xf32>, vector<4x8x8xf32> -> vector<4x8x8xf32>
    "tpu.trace_stop"() : () -> ()
    %c0_24 = arith.constant 0 : index
    %c0_25 = arith.constant 0 : index
    %c0_26 = arith.constant 0 : index
    %76 = vector.load %arg4[%c0_24, %c0_25, %c0_26] : memref<3x128x128xf32, #tpu.memory_space<vmem>>, vector<1x128x128xf32>
    %77 = vector.shape_cast %76 : vector<1x128x128xf32> to vector<128x128xf32>
    %78 = vector.extract_strided_slice %75 {offsets = [0, 0, 0], sizes = [1, 8, 8], strides = [1, 1, 1]} : vector<4x8x8xf32> to vector<1x8x8xf32>
    %79 = vector.shape_cast %78 : vector<1x8x8xf32> to vector<8x8xf32>
    %80 = vector.extract_strided_slice %77 {offsets = [0, 0], sizes = [8, 128], strides = [1, 1]} : vector<128x128xf32> to vector<8x128xf32>
    %cst_27 = arith.constant dense<0.000000e+00> : vector<8x128xf32>
    %81 = tpu.matmul %79, %80, %cst_27 {dimension_numbers = #tpu.dot_dimension_numbers<[1], [0], [0], [1], [0, 0, 1, 1], [], []>} : vector<8x8xf32>, vector<8x128xf32>, vector<8x128xf32> -> vector<8x128xf32>
    %82 = vector.broadcast %7 : vector<1x128xf32> to vector<8x128xf32>
    %83 = arith.addf %82, %81 : vector<8x128xf32>
    %84 = vector.extract_strided_slice %75 {offsets = [1, 0, 0], sizes = [1, 8, 8], strides = [1, 1, 1]} : vector<4x8x8xf32> to vector<1x8x8xf32>
    %85 = vector.shape_cast %84 : vector<1x8x8xf32> to vector<8x8xf32>
    %86 = vector.extract_strided_slice %77 {offsets = [8, 0], sizes = [8, 128], strides = [1, 1]} : vector<128x128xf32> to vector<8x128xf32>
    %cst_28 = arith.constant dense<0.000000e+00> : vector<8x128xf32>
    %87 = tpu.matmul %85, %86, %cst_28 {dimension_numbers = #tpu.dot_dimension_numbers<[1], [0], [0], [1], [0, 0, 1, 1], [], []>} : vector<8x8xf32>, vector<8x128xf32>, vector<8x128xf32> -> vector<8x128xf32>
    %88 = arith.addf %83, %87 : vector<8x128xf32>
    %89 = vector.extract_strided_slice %75 {offsets = [2, 0, 0], sizes = [1, 8, 8], strides = [1, 1, 1]} : vector<4x8x8xf32> to vector<1x8x8xf32>
    %90 = vector.shape_cast %89 : vector<1x8x8xf32> to vector<8x8xf32>
    %91 = vector.extract_strided_slice %77 {offsets = [16, 0], sizes = [8, 128], strides = [1, 1]} : vector<128x128xf32> to vector<8x128xf32>
    %cst_29 = arith.constant dense<0.000000e+00> : vector<8x128xf32>
    %92 = tpu.matmul %90, %91, %cst_29 {dimension_numbers = #tpu.dot_dimension_numbers<[1], [0], [0], [1], [0, 0, 1, 1], [], []>} : vector<8x8xf32>, vector<8x128xf32>, vector<8x128xf32> -> vector<8x128xf32>
    %93 = arith.addf %88, %92 : vector<8x128xf32>
    %94 = vector.extract_strided_slice %75 {offsets = [3, 0, 0], sizes = [1, 8, 8], strides = [1, 1, 1]} : vector<4x8x8xf32> to vector<1x8x8xf32>
    %95 = vector.shape_cast %94 : vector<1x8x8xf32> to vector<8x8xf32>
    %96 = vector.extract_strided_slice %77 {offsets = [24, 0], sizes = [8, 128], strides = [1, 1]} : vector<128x128xf32> to vector<8x128xf32>
    %cst_30 = arith.constant dense<0.000000e+00> : vector<8x128xf32>
    %97 = tpu.matmul %95, %96, %cst_30 {dimension_numbers = #tpu.dot_dimension_numbers<[1], [0], [0], [1], [0, 0, 1, 1], [], []>} : vector<8x8xf32>, vector<8x128xf32>, vector<8x128xf32> -> vector<8x128xf32>
    %98 = arith.addf %93, %97 : vector<8x128xf32>
    %99 = arith.addf %98, %1 : vector<8x128xf32>
    %cst_31 = arith.constant dense<0.000000e+00> : vector<8xf32>
    %100 = vector.multi_reduction <add>, %99, %cst_31 [1] : vector<8x128xf32> to vector<8xf32>
    %101 = vector.shape_cast %100 : vector<8xf32> to vector<8x1xf32>
    %cst_32 = arith.constant 3.125000e-02 : f32
    %102 = vector.broadcast %cst_32 : f32 to vector<8x1xf32>
    %103 = arith.mulf %101, %102 : vector<8x1xf32>
    %104 = vector.broadcast %103 : vector<8x1xf32> to vector<8x128xf32>
    %105 = arith.subf %99, %104 : vector<8x128xf32>
    %106 = vector.broadcast %18 : vector<1x128xf32> to vector<8x128xf32>
    %107 = arith.mulf %105, %106 : vector<8x128xf32>
    %108 = arith.mulf %107, %107 : vector<8x128xf32>
    %cst_33 = arith.constant dense<0.000000e+00> : vector<8xf32>
    %109 = vector.multi_reduction <add>, %108, %cst_33 [1] : vector<8x128xf32> to vector<8xf32>
    %110 = vector.shape_cast %109 : vector<8xf32> to vector<8x1xf32>
    %cst_34 = arith.constant 3.125000e-02 : f32
    %111 = vector.broadcast %cst_34 : f32 to vector<8x1xf32>
    %112 = arith.mulf %110, %111 : vector<8x1xf32>
    %cst_35 = arith.constant 9.99999996E-13 : f32
    %113 = vector.broadcast %cst_35 : f32 to vector<8x1xf32>
    %114 = arith.addf %112, %113 : vector<8x1xf32>
    %115 = math.rsqrt %114 : vector<8x1xf32>
    %116 = vector.broadcast %115 : vector<8x1xf32> to vector<8x128xf32>
    %117 = arith.mulf %107, %116 : vector<8x128xf32>
    %118 = vector.broadcast %8 : vector<1x128xf32> to vector<8x128xf32>
    %119 = arith.mulf %117, %118 : vector<8x128xf32>
    %120 = vector.broadcast %9 : vector<1x128xf32> to vector<8x128xf32>
    %121 = arith.addf %119, %120 : vector<8x128xf32>
    %c1_36 = arith.constant 1 : index
    %c0_37 = arith.constant 0 : index
    %c0_38 = arith.constant 0 : index
    %122 = vector.load %arg4[%c1_36, %c0_37, %c0_38] : memref<3x128x128xf32, #tpu.memory_space<vmem>>, vector<1x128x128xf32>
    %123 = vector.shape_cast %122 : vector<1x128x128xf32> to vector<128x128xf32>
    %cst_39 = arith.constant dense<0.000000e+00> : vector<8x128xf32>
    %124 = tpu.matmul %121, %123, %cst_39 {dimension_numbers = #tpu.dot_dimension_numbers<[1], [0], [0], [1], [0, 0, 1, 1], [], []>} : vector<8x128xf32>, vector<128x128xf32>, vector<8x128xf32> -> vector<8x128xf32>
    %125 = vector.broadcast %10 : vector<1x128xf32> to vector<8x128xf32>
    %126 = arith.addf %124, %125 : vector<8x128xf32>
    %cst_40 = arith.constant 5.000000e-01 : f32
    %127 = vector.broadcast %cst_40 : f32 to vector<8x128xf32>
    %128 = arith.mulf %126, %127 : vector<8x128xf32>
    %cst_41 = arith.constant 0.707106769 : f32
    %129 = vector.broadcast %cst_41 : f32 to vector<8x128xf32>
    %130 = arith.mulf %126, %129 : vector<8x128xf32>
    %131 = math.erf %130 : vector<8x128xf32>
    %cst_42 = arith.constant 1.000000e+00 : f32
    %132 = vector.broadcast %cst_42 : f32 to vector<8x128xf32>
    %133 = arith.addf %132, %131 : vector<8x128xf32>
    %134 = arith.mulf %128, %133 : vector<8x128xf32>
    %c2_43 = arith.constant 2 : index
    %c0_44 = arith.constant 0 : index
    %c0_45 = arith.constant 0 : index
    %135 = vector.load %arg4[%c2_43, %c0_44, %c0_45] : memref<3x128x128xf32, #tpu.memory_space<vmem>>, vector<1x128x128xf32>
    %136 = vector.shape_cast %135 : vector<1x128x128xf32> to vector<128x128xf32>
    %cst_46 = arith.constant dense<0.000000e+00> : vector<8x128xf32>
    %137 = tpu.matmul %134, %136, %cst_46 {dimension_numbers = #tpu.dot_dimension_numbers<[1], [0], [0], [1], [0, 0, 1, 1], [], []>} : vector<8x128xf32>, vector<128x128xf32>, vector<8x128xf32> -> vector<8x128xf32>
    %138 = vector.broadcast %11 : vector<1x128xf32> to vector<8x128xf32>
    %139 = arith.addf %137, %138 : vector<8x128xf32>
    %140 = arith.addf %139, %121 : vector<8x128xf32>
    %cst_47 = arith.constant dense<0.000000e+00> : vector<8xf32>
    %141 = vector.multi_reduction <add>, %140, %cst_47 [1] : vector<8x128xf32> to vector<8xf32>
    %142 = vector.shape_cast %141 : vector<8xf32> to vector<8x1xf32>
    %cst_48 = arith.constant 3.125000e-02 : f32
    %143 = vector.broadcast %cst_48 : f32 to vector<8x1xf32>
    %144 = arith.mulf %142, %143 : vector<8x1xf32>
    %145 = vector.broadcast %144 : vector<8x1xf32> to vector<8x128xf32>
    %146 = arith.subf %140, %145 : vector<8x128xf32>
    %147 = vector.broadcast %18 : vector<1x128xf32> to vector<8x128xf32>
    %148 = arith.mulf %146, %147 : vector<8x128xf32>
    %149 = arith.mulf %148, %148 : vector<8x128xf32>
    %cst_49 = arith.constant dense<0.000000e+00> : vector<8xf32>
    %150 = vector.multi_reduction <add>, %149, %cst_49 [1] : vector<8x128xf32> to vector<8xf32>
    %151 = vector.shape_cast %150 : vector<8xf32> to vector<8x1xf32>
    %cst_50 = arith.constant 3.125000e-02 : f32
    %152 = vector.broadcast %cst_50 : f32 to vector<8x1xf32>
    %153 = arith.mulf %151, %152 : vector<8x1xf32>
    %cst_51 = arith.constant 9.99999996E-13 : f32
    %154 = vector.broadcast %cst_51 : f32 to vector<8x1xf32>
    %155 = arith.addf %153, %154 : vector<8x1xf32>
    %156 = math.rsqrt %155 : vector<8x1xf32>
    %157 = vector.broadcast %156 : vector<8x1xf32> to vector<8x128xf32>
    %158 = arith.mulf %148, %157 : vector<8x128xf32>
    %159 = vector.broadcast %12 : vector<1x128xf32> to vector<8x128xf32>
    %160 = arith.mulf %158, %159 : vector<8x128xf32>
    %161 = vector.broadcast %13 : vector<1x128xf32> to vector<8x128xf32>
    %162 = arith.addf %160, %161 : vector<8x128xf32>
    %c0_52 = arith.constant 0 : index
    %c0_53 = arith.constant 0 : index
    %c0_54 = arith.constant 0 : index
    %163 = vector.load %arg6[%c0_52, %c0_53, %c0_54] : memref<1x8x128xf32, #tpu.memory_space<vmem>>, vector<1x8x128xf32>
    %164 = vector.shape_cast %163 : vector<1x8x128xf32> to vector<8x128xf32>
    %165 = vector.shape_cast %162 : vector<8x128xf32> to vector<1x8x128xf32>
    tpu.vector_store %arg6[%c0_52, %c0_53, %c0_54], %165 {strides = array<i32>} : memref<1x8x128xf32, #tpu.memory_space<vmem>>, vector<1x8x128xf32>,
    return
  }
  func.func @transform_0(%arg0: i32) -> (i32, i32, i32) {
    %c0_i32 = arith.constant 0 : i32
    %c0_i32_0 = arith.constant 0 : i32
    %c0_i32_1 = arith.constant 0 : i32
    return %arg0, %c0_i32, %c0_i32_0 : i32, i32, i32
  }
  func.func @transform_1(%arg0: i32) -> (i32, i32, i32, i32) {
    %c0_i32 = arith.constant 0 : i32
    %c0_i32_0 = arith.constant 0 : i32
    %c0_i32_1 = arith.constant 0 : i32
    %c0_i32_2 = arith.constant 0 : i32
    return %arg0, %c0_i32, %c0_i32_0, %c0_i32_1 : i32, i32, i32, i32
  }
  func.func @transform_2(%arg0: i32) -> (i32, i32) {
    %c0_i32 = arith.constant 0 : i32
    %c0_i32_0 = arith.constant 0 : i32
    %c0_i32_1 = arith.constant 0 : i32
    return %c0_i32, %c0_i32_0 : i32, i32
  }
  func.func @transform_3(%arg0: i32) -> (i32, i32, i32) {
    %c0_i32 = arith.constant 0 : i32
    %c0_i32_0 = arith.constant 0 : i32
    %c0_i32_1 = arith.constant 0 : i32
    %c0_i32_2 = arith.constant 0 : i32
    return %c0_i32, %c0_i32_0, %c0_i32_1 : i32, i32, i32
  }
  func.func @transform_4(%arg0: i32) -> (i32, i32) {
    %c0_i32 = arith.constant 0 : i32
    %c0_i32_0 = arith.constant 0 : i32
    %c0_i32_1 = arith.constant 0 : i32
    return %c0_i32, %c0_i32_0 : i32, i32
  }
  func.func @transform_5(%arg0: i32) -> (i32, i32, i32) {
    %c0_i32 = arith.constant 0 : i32
    %c0_i32_0 = arith.constant 0 : i32
    %c0_i32_1 = arith.constant 0 : i32
    return %arg0, %c0_i32, %c0_i32_0 : i32, i32, i32
  }
}

</mosaic_0001>

<bundles_post_ra>
// kernel: tpu_custom_call.1
= control target key start
LH: loop header
LB: loop body
LE: loop exit
PB: predicated region body
PF: predicated region fallthrough
CT: control target
= control target key end

     0   :  { %10 = vsyncpa [#allocation3], 0  ;;  %s2975_s0 = inlined_call_operand.hbm [shape: f32[2,8,128], index: 0, kind: input, shape index: {}]   ;;  %s2976_s1 = inlined_call_operand.vmem [shape: f32[2,1,1,8], index: 1, kind: input, shape index: {}]   ;;  %s2977_s2 = inlined_call_operand.hbm [shape: f32[128,384], index: 2, kind: input, shape index: {}]   ;;  %s2978_s3 = inlined_call_operand.hbm [shape: f32[3,128,128], index: 3, kind: input, shape index: {}]   ;;  %s2979_s4 = inlined_call_operand.hbm [shape: f32[10,128], index: 4, kind: input, shape index: {}]   ;;  %s2980_s5 = inlined_call_operand.hbm [shape: f32[2,8,128], index: 5, kind: output, shape index: {}]  }
   0x1   :  { %12 = vsyncpa [#allocation3 + $0x1], 0 }
   0x2   :  { %13 = vsyncpa [#allocation6], 0 }
   0x3   :  { %14 = vsyncpa [#allocation9], 0 }
   0x4   :  { %15 = vsyncpa [#allocation4], 0 }
   0x5   :  { %17 = vsyncpa [#allocation4 + $0x1], 0  ;;  %s2593_s18 = smov 0   ;;  %s2595_s19 = smov 0  }
   0x6   :  { %s2597_s20 = smov 0   ;;  %s2599_s21 = smov 0  }
   0x7 LB: > { %s2614_s22 = sadd.s32 4294967295, %s2546_s21   ;;  %s1859_s23 = sadd.s32 4294967294, %s2546_s21   ;;  %s2546_s21 = sphi %s2599_s21, %s3003_s21   ;;  %s2542_s20 = sphi %s2597_s20, %s3002_s20   ;;  %s2538_s19 = sphi %s2595_s19, %s3001_s19   ;;  %s2534_s18 = sphi %s2593_s18, %s3000_s18  }
   0x8   : > { %p43_p0 = scmp.ne.s32.totalorder %s2538_s19, %s2534_s18  ;;  %p2981_p1 = scmp.eq.s32.totalorder %s2614_s22, 0 }
   0x9   : > { %p162_p3 = scmp.eq.s32.totalorder %s1859_s23, 1  ;;  %p1860_p5 = scmp.ge.s32.totalorder %s2546_s21, 1 }
   0xa   : > { %p2623_p4 = por %p2981_p1, %p43_p0  ;;  %p169_p7 = scmp.lt.s32.totalorder %s2546_s21, 3 }
   0xb   : > { %p2628_p6 = por %p162_p3, %p43_p0  ;;  %s2548_s27 = smov [#allocation5]  }
   0xc   : > { %s2984_s24 = scalar_select %p2623_p4, 1, 0 }
   0xd   : > { %s2985_s25 = scalar_select %p2628_p6, 1, 0 }
   0xe   : > { %p2633_p8 = pnand %p1860_p5, %p169_p7  ;;  %s181_s28 = sshll.u32 %s2548_s27, 4  ;;  %s2637_s28 = int_to_ptr.vmem [resolvable:$true] %s181_s28 }
   0xf   : > { %s2549_s30 = smov [#allocation7]   ;;  %s2358_s9 = scalar_lea.hbm %s2977_s2, 6144 }
  0x10   : > { %s2986_s26 = scalar_select %p2633_p8, 1, 0 }
  0x11   : > { %p2265_p9 = pneg %p2633_p8  ;;  %s194_s6 = sshll.u32 %s2549_s30, 4  ;;  %s2648_s6 = int_to_ptr.vmem [resolvable:$true] %s194_s6 }
  0x12   : > { %p2359_p12 = scmp.ne.s32.totalorder %s2977_s2, %s2358_s9  ;;  %p2365_p5 = scmp.lt.u32.totalorder %s2358_s9, %s2977_s2 }
  0x13   : > { %p2644_p11 = pnand %p2265_p9, %p2981_p1 }
  0x15   : > { %p2658_p13 = pneg %p2644_p11 }
  0x17   : > { %p2361_p0 = pnand %p2658_p13, %p2359_p12 }
  0x19   : > { %p2362_p3 = pneg %p2361_p0 }
  0x1b   : > { %p2367_p7 = pnand %p2365_p5, %p2362_p3 }
  0x1d   : > { %2370 = shalt.err (!%p2367_p7)
}
  0x1e   : > { %s2371_s15 = scalar_lea.vmem %s2637_s28, 6144  ;;  %p2379_p2 = scmp.lt.s32.totalorder %s2637_s28, %s2637_s28 }
  0x1f   : > { %p2372_p9 = scmp.ne.s32.totalorder %s2637_s28, %s2371_s15  ;;  %p2380_p6 = scmp.lt.s32.totalorder %s2371_s15, %s2371_s15 }
  0x21   : > { %p2374_p10 = pnand %p2372_p9, %p2658_p13  ;;  %p2381_p12 = por %p2380_p6, %p2379_p2 }
  0x23   : > { %p2375_p1 = pneg %p2374_p10 }
  0x25   : > { %p2382_p0 = pnand %p2381_p12, %p2375_p1 }
  0x27   : > { %2385 = shalt.err (!%p2382_p0)
}
  0x28   : > { %s2550_s16 = smov 384   ;;  %s2551_s17 = smov 24  }
  0x29   : > { %2268 = dma.hbm_to_vmem [thread:$0]  (!%p2644_p11), %s2977_s2, 6144, %s2637_s28, [#allocation6], %s2550_s16, %s2550_s16, %s2551_s17  }
  0x2a   : > { %s2386_s8 = scalar_lea.hbm %s2978_s3, 6144 }
  0x2b   : > { %p2387_p2 = scmp.ne.s32.totalorder %s2978_s3, %s2386_s8  ;;  %p2393_p10 = scmp.lt.u32.totalorder %s2386_s8, %s2978_s3 }
  0x2d   : > { %p2389_p1 = pnand %p2387_p2, %p2658_p13 }
  0x2f   : > { %p2390_p6 = pneg %p2389_p1 }
  0x31   : > { %p2395_p3 = pnand %p2393_p10, %p2390_p6 }
  0x33   : > { %2398 = shalt.err (!%p2395_p3)
}
  0x34   : > { %s2399_s28 = scalar_lea.vmem %s2648_s6, 6144  ;;  %p2407_p12 = scmp.lt.s32.totalorder %s2648_s6, %s2648_s6 }
  0x35   : > { %p2400_p5 = scmp.ne.s32.totalorder %s2648_s6, %s2399_s28  ;;  %p2408_p0 = scmp.lt.s32.totalorder %s2399_s28, %s2399_s28 }
  0x37   : > { %p2402_p7 = pnand %p2400_p5, %p2658_p13  ;;  %p2409_p2 = por %p2408_p0, %p2407_p12 }
  0x39   : > { %p2403_p9 = pneg %p2402_p7 }
  0x3b   : > { %p2410_p1 = pnand %p2409_p2, %p2403_p9 }
  0x3d   : > { %2413 = shalt.err (!%p2410_p1)
}
  0x3e   : > { %s2552_s14 = smov 128   ;;  %s2553_s15 = smov 8  }
  0x3f   : > { %2271 = dma.hbm_to_vmem [thread:$0]  (!%p2644_p11), %s2978_s3, 6144, %s2648_s6, [#allocation6], %s2552_s14, %s2552_s14, %s2553_s15  }
  0x40   : > { %s2554_s23 = smov [#allocation8]   ;;  %s2703_s30 = sadd.s32 1, %s2546_s21  }
  0x41   : > { %s207_s27 = sshll.u32 %s2554_s23, 4  ;;  %s2414_s9 = scalar_lea.hbm %s2979_s4, 256  ;;  %s208_s27 = int_to_ptr.vmem [resolvable:$true] %s207_s27 }
  0x42   : > { %p2415_p6 = scmp.ne.s32.totalorder %s2979_s4, %s2414_s9  ;;  %p2421_p5 = scmp.lt.u32.totalorder %s2414_s9, %s2979_s4 }
  0x44   : > { %p2417_p10 = pnand %p2415_p6, %p2658_p13 }
  0x46   : > { %p2418_p3 = pneg %p2417_p10 }
  0x48   : > { %p2423_p7 = pnand %p2421_p5, %p2418_p3 }
  0x4a   : > { %2426 = shalt.err (!%p2423_p7)
}
  0x4b   : > { %s2427_s6 = scalar_lea.vmem %s208_s27, 256  ;;  %p2435_p2 = scmp.lt.s32.totalorder %s208_s27, %s208_s27 }
  0x4c   : > { %p2428_p9 = scmp.ne.s32.totalorder %s208_s27, %s2427_s6  ;;  %p2436_p1 = scmp.lt.s32.totalorder %s2427_s6, %s2427_s6 }
  0x4e   : > { %p2430_p12 = pnand %p2428_p9, %p2658_p13  ;;  %p2437_p4 = por %p2436_p1, %p2435_p2 }
  0x50   : > { %p2431_p0 = pneg %p2430_p12 }
  0x52   : > { %p2438_p8 = pnand %p2437_p4, %p2431_p0 }
  0x54   : > { %2441 = shalt.err (!%p2438_p8)
}
  0x55   : > { %2274 = dma.hbm_to_vmem [thread:$0]  (!%p2644_p11), %s2979_s4, 256, %s208_s27, [#allocation9], %s2552_s14, %s2552_s14, %s2553_s15  }
  0x56   : > { %s27_s12 = ssub.s32 %s2546_s21, %s2703_s30  ;;  %s30_s23 = sadd.s32 1, %s2542_s20 }
  0x57   : > { %p28_p4 = scmp.eq.s32.totalorder %s27_s12, 0  ;;  %p37_p8 = scmp.ne.s32.totalorder %s2542_s20, %s2538_s19 }
  0x58   : > { %p38_p13 = scmp.eq.s32.totalorder %s2546_s21, 0  ;;  %p2286_p6 = scmp.lt.s32.totalorder %s2546_s21, 2 }
  0x59   : > { %s2731_s29 = scalar_select %p28_p4, %s2542_s20, %s30_s23  }
  0x5a   : > { %p39_p10 = por %p38_p13, %p37_p8  ;;  %p2989_p3 = scmp.eq.s32.totalorder %s2614_s22, 1 }
  0x5b   : > { %s221_s8 = sand.u32 1, %s2542_s20   ;;  %s1866_s9 = sshll.u32 %s2546_s21, 7 }
  0x5c   : > { %p2735_p5 = por %p2989_p3, %p37_p8  ;;  %s1865_s10 = sshll.u32 %s221_s8, 3 }
  0x5d   : > { %s2744_s14 = scalar_lea.hbm %s2975_s0, %s1866_s9  ;;  %s225_s15 = scalar_lea.vmem [#allocation2], %s1865_s10 }
  0x5e   : > { %s232_s27 = sshll.u32 %s225_s15, 4  ;;  %p2746_p11 = pnand %p2286_p6, %p39_p10  ;;  %s2750_s27 = int_to_ptr.vmem [resolvable:$true] %s232_s27 }
  0x5f   : > { %s222_s6 = scalar_lea.sflag [#allocation3], %s221_s8  ;;  %s2442_s16 = scalar_lea.hbm %s2744_s14, 128 }
  0x60   : > { %p2443_p7 = scmp.ne.s32.totalorder %s2744_s14, %s2442_s16  ;;  %p2444_p9 = pneg %p2746_p11 }
  0x61   : > { %s2447_s23 = scalar_lea.hbm %s2975_s0, 256  ;;  %p2448_p2 = scmp.lt.u32.totalorder %s2744_s14, %s2975_s0 }
  0x62   : > { %p2445_p12 = pnand %p2444_p9, %p2443_p7  ;;  %p2449_p1 = scmp.lt.u32.totalorder %s2447_s23, %s2442_s16 }
  0x63   : > { %p2451_p8 = scmp.lt.u32.totalorder %s2442_s16, %s2744_s14 }
  0x64   : > { %p2446_p0 = pneg %p2445_p12  ;;  %p2450_p4 = por %p2449_p1, %p2448_p2 }
  0x66   : > { %p2452_p13 = por %p2451_p8, %p2450_p4 }
  0x68   : > { %p2453_p6 = pnand %p2452_p13, %p2446_p0 }
  0x6a   : > { %2456 = shalt.err (!%p2453_p6)
}
  0x6b   : > { %s2457_s8 = scalar_lea.vmem %s2750_s27, 128  ;;  %s2555_s11 = smov [#allocation2]  }
  0x6c   : > { %p2458_p10 = scmp.ne.s32.totalorder %s2750_s27, %s2457_s8  ;;  %s2462_s13 = sshll.u32 %s2555_s11, 4  ;;  %s2463_s13 = int_to_ptr.vmem [resolvable:$false] %s2462_s13 }
  0x6d   : > { %s2464_s15 = scalar_lea.vmem %s2463_s13, 256  ;;  %p2465_p12 = scmp.lt.s32.totalorder %s2750_s27, %s2463_s13 }
  0x6e   : > { %p2460_p3 = pnand %p2458_p10, %p2444_p9  ;;  %p2466_p2 = scmp.lt.s32.totalorder %s2464_s15, %s2457_s8 }
  0x70   : > { %p2461_p7 = pneg %p2460_p3  ;;  %p2467_p1 = por %p2466_p2, %p2465_p12 }
  0x72   : > { %p2468_p4 = pnand %p2467_p1, %p2461_p7 }
  0x74   : > { %2471 = shalt.err (!%p2468_p4)
}
  0x75   : > { %2278 = dma.hbm_to_vmem [thread:$0]  (!%p2746_p11), %s2744_s14, 128, %s2750_s27, %s222_s6  }
  0x76   : > { %p2992_p0 = scmp.ne.s32.totalorder %s2986_s26, 0 }
  0x77   : > { %s2780_s16 = sand.u32 (!%p2992_p0), 1, %s2538_s19   ;;  %p2993_p9 = scmp.ne.s32.totalorder (!%p2992_p0), %s2984_s24, 0 }
  0x78   : > { %247 = sbr.rel (%p2992_p0) target bundleno = 2557 (0x9fd), region = 40  ;;  %s1868_s17 = sshll.u32 (!%p2992_p0), %s2780_s16, 3 }
  0x79   : > { %s250_s12 = scalar_lea.sflag (!%p2992_p0), [#allocation3], %s2780_s16  ;;  %s2786_s23 = scalar_lea.vmem (!%p2992_p0), [#allocation2], %s1868_s17 }
  0x7f   : > { %2517 = dma.done.wait (%p2993_p9), %s250_s12, 128  }
  0x80   : > { %2519 = vsyncadd (%p2993_p9), %s250_s12, 4294967168  ;;  %p2994_p11 = scmp.eq.s32.totalorder %s2614_s22, 0 }
  0x82   : > { %2521 = dma.done.wait (%p2994_p11), [#allocation6], 12288   ;;  %p2995_p8 = pmov %p2994_p11 }
  0x84   : > { %2523 = vsyncadd (%p2995_p8), [#allocation6], 4294955008  ;;  %p2996_p13 = pmov %p2995_p8 }
  0x85   : > { %p2997_p6 = pmov %p2995_p8 }
  0x86   : > { %2525 = dma.done.wait (%p2996_p13), [#allocation9], 256  }
  0x87   : > { %2527 = vsyncadd (%p2997_p6), [#allocation9], 4294967040  ;;  %v2556_v0 = vmov 0.0   ;;  %v316_v1 = vld [vmem:[#allocation5 + $0x8] sm:$0xff]  ;;  %v319_v2 = vld [vmem:[#allocation5 + $0x20] sm:$0xff]  ;;  %vm2557_vm0 = vmmov 0  }
  0x88   : > { %427 = vmatprep.mubr.f32.mxu0 %v2556_v0  ;;  %v315_v3 = vld [vmem:[#allocation5] sm:$0xff]  ;;  %v2145_v4 = vpack.c.bf16 %v319_v2, %v316_v1  ;;  %v318_v5 = vld [vmem:[#allocation5 + $0x18] sm:$0xff]  ;;  %v325_v7 = vld [vmem:[#allocation5 + $0x50] sm:$0xff]  ;;  %2012 = vmatprep.mubr.msk.f32.mxu1 %vm2557_vm0, %v2556_v0  ;;  %v2558_v53 = vmov 0.0|0.0   ;;  %vm543_vm1 = vcmask 64512   ;;  %s2559_s24 = smov 120  }
  0x89   : > { %v322_v6 = vld [vmem:[#allocation5 + $0x38] sm:$0xff]  ;;  %v2147_v8 = vpack.c.bf16 %v318_v5, %v315_v3  ;;  %v321_v10 = vld [vmem:[#allocation5 + $0x30] sm:$0xff]  ;;  %v324_v11 = vld [vmem:[#allocation5 + $0x48] sm:$0xff]  ;;  %2177 = vmatprep.subr.bf16.mxu1 %v2558_v53  ;;  %s2560_s26 = smov 104   ;;  %s2561_s14 = smov 112  }
  0x8a   : > { %v2149_v9 = vpack.c.bf16 %v325_v7, %v322_v6  ;;  %v328_v12 = vld [vmem:[#allocation5 + $0x68] sm:$0xff]  ;;  %2146 = vmatprep.subr.bf16.mxu0 %v2145_v4  ;;  %v331_v13 = vld [vmem:[#allocation5 + $0x80] sm:$0xff]  ;;  %v2151_v14 = vpack.c.bf16 %v324_v11, %v321_v10  ;;  %v330_v17 = vld [vmem:[#allocation5 + $0x78] sm:$0xff]  ;;  %p295_p10 = scmp.lt.s32.totalorder %s2614_s22, 1  ;;  %s1902_s10 = sshll.u32 %s2614_s22, 7 }
  0x8b   : > { %2148 = vmatpush1.bf16.msra.mxu0 %v2147_v8  ;;  %v2153_v15 = vpack.c.bf16 %v331_v13, %v328_v12  ;;  %v327_v16 = vld [vmem:[#allocation5 + $0x60] sm:$0xff]  ;;  %v334_v18 = vld [vmem:[#allocation5 + $0x98] sm:$0xff]  ;;  %v337_v19 = vld [vmem:[#allocation5 + $0xb0] sm:$0xff]  ;;  %s294_s8 = scalar_lea.vmem [#allocation10], %s1868_s17  ;;  %s2931_s12 = scalar_lea.hbm %s2980_s5, %s1902_s10 }
  0x8c   : > { %2150 = vmatprep.subr.bf16.mxu0 %v2149_v9  ;;  %v2155_v20 = vpack.c.bf16 %v330_v17, %v327_v16  ;;  %v2157_v21 = vpack.c.bf16 %v337_v19, %v334_v18  ;;  %v333_v22 = vld [vmem:[#allocation5 + $0x90] sm:$0xff]  ;;  %v336_v23 = vld [vmem:[#allocation5 + $0xa8] sm:$0xff]  ;;  %v343_v25 = vld [vmem:[#allocation5 + $0xe0] sm:$0xff]  ;;  %s296_s27 = scalar_select %p295_p10, %s2614_s22, 1 }
  0x8d   : > { %v340_v24 = vld [vmem:[#allocation5 + $0xc8] sm:$0xff]  ;;  %v2159_v26 = vpack.c.bf16 %v336_v23, %v333_v22  ;;  %v339_v28 = vld [vmem:[#allocation5 + $0xc0] sm:$0xff]  ;;  %v342_v29 = vld [vmem:[#allocation5 + $0xd8] sm:$0xff]  ;;  %s1751_s11 = sshll.u32 %s294_s8, 4  ;;  %s2562_s22 = smov [#allocation10]   ;;  %s2933_s11 = int_to_ptr.vmem [resolvable:$true] %s1751_s11 }
  0x8e   : > { %v2161_v27 = vpack.c.bf16 %v343_v25, %v340_v24  ;;  %v346_v30 = vld [vmem:[#allocation5 + $0xf8] sm:$0xff]  ;;  %v349_v31 = vld [vmem:[#allocation5 + $0x110] sm:$0xff]  ;;  %v2163_v32 = vpack.c.bf16 %v342_v29, %v339_v28  ;;  %v348_v35 = vld [vmem:[#allocation5 + $0x108] sm:$0xff]  ;;  %s297_s9 = scalar_lea.vmem %s2976_s1, %s296_s27  ;;  %v310_v28 = vlaneseq  ;;  %s2476_s17 = sshll.u32 %s2562_s22, 4  ;;  %s2477_s17 = int_to_ptr.vmem [resolvable:$false] %s2476_s17 }
  0x8f   : > { %2152 = vmatpush1.bf16.msra.mxu0 %v2151_v14  ;;  %v2165_v33 = vpack.c.bf16 %v349_v31, %v346_v30  ;;  %v345_v34 = vld [vmem:[#allocation5 + $0xf0] sm:$0xff]  ;;  %v352_v36 = vld [vmem:[#allocation5 + $0x128] sm:$0xff]  ;;  %v355_v37 = vld [vmem:[#allocation5 + $0x140] sm:$0xff]  ;;  %p2479_p2 = scmp.lt.s32.totalorder %s2933_s11, %s2477_s17 }
  0x90   : > { %2154 = vmatprep.subr.bf16.mxu0 %v2153_v15  ;;  %v2167_v38 = vpack.c.bf16 %v348_v35, %v345_v34  ;;  %v2169_v39 = vpack.c.bf16 %v355_v37, %v352_v36  ;;  %v351_v40 = vld [vmem:[#allocation5 + $0x120] sm:$0xff]  ;;  %v354_v41 = vld [vmem:[#allocation5 + $0x138] sm:$0xff]  ;;  %v361_v43 = vld [vmem:[#allocation5 + $0x170] sm:$0xff]  ;;  %v845_v30 = vshrl.u32 %v310_v28, 7 }
  0x91   : > { %v358_v42 = vld [vmem:[#allocation5 + $0x158] sm:$0xff]  ;;  %v2171_v44 = vpack.c.bf16 %v354_v41, %v351_v40  ;;  %v357_v46 = vld [vmem:[#allocation5 + $0x150] sm:$0xff]  ;;  %v360_v47 = vld [vmem:[#allocation5 + $0x168] sm:$0xff] }
  0x92   : > { %v2173_v45 = vpack.c.bf16 %v361_v43, %v358_v42  ;;  %v2175_v48 = vpack.c.bf16 %v360_v47, %v357_v46  ;;  %v2802_v49 = vld [vmem:[%s2786_s23] sm:$0xff]  ;;  %v320_v51 = vld [vmem:[#allocation5 + $0x28] sm:$0xff]  ;;  %v323_v52 = vld [vmem:[#allocation5 + $0x40] sm:$0xff]  ;;  %v846_v31 = vsub.s32 0, %v845_v30  ;;  %s1738_s23 = scalar_lea.sflag [#allocation4], %s2780_s16 }
  0x93   : > { %2156 = vmatpush1.bf16.msra.mxu0 %v2155_v20  ;;  %v317_v50 = vld [vmem:[#allocation5 + $0x10] sm:$0xff]  ;;  %v326_v55 = vld [vmem:[#allocation5 + $0x58] sm:$0xff]  ;;  %v332_v58 = vld [vmem:[#allocation5 + $0x88] sm:$0xff] }
  0x94   : > { %2158 = vmatprep.subr.bf16.mxu0 %v2157_v21  ;;  %v2178_v54 = vpack.c.bf16 %v320_v51, %v317_v50  ;;  %v2181_v56 = vpack.c.bf16 %v326_v55, %v323_v52  ;;  %v329_v57 = vld [vmem:[#allocation5 + $0x70] sm:$0xff]  ;;  %v335_v60 = vld [vmem:[#allocation5 + $0xa0] sm:$0xff]  ;;  %v338_v61 = vld [vmem:[#allocation5 + $0xb8] sm:$0xff] }
  0x95   : > { %v2184_v59 = vpack.c.bf16 %v332_v58, %v329_v57  ;;  %v2187_v62 = vpack.c.bf16 %v338_v61, %v335_v60  ;;  %v341_v63 = vld [vmem:[#allocation5 + $0xd0] sm:$0xff]  ;;  %v344_v1 = vld [vmem:[#allocation5 + $0xe8] sm:$0xff]  ;;  %v347_v3 = vld [vmem:[#allocation5 + $0x100] sm:$0xff] }
  0x96   : > { %2179 = vmatpush3.bf16.msra.mxu1 %v2178_v54  ;;  %v2190_v2 = vpack.c.bf16 %v344_v1, %v341_v63  ;;  %v350_v4 = vld [vmem:[#allocation5 + $0x118] sm:$0xff]  ;;  %v353_v6 = vld [vmem:[#allocation5 + $0x130] sm:$0xff]  ;;  %v356_v7 = vld [vmem:[#allocation5 + $0x148] sm:$0xff] }
  0x97   : > { %2160 = vmatpush1.bf16.msra.mxu0 %v2159_v26  ;;  %2180 = vmatprep.subr.bf16.mxu1 %v2558_v53  ;;  %v2193_v5 = vpack.c.bf16 %v350_v4, %v347_v3  ;;  %v2196_v8 = vpack.c.bf16 %v356_v7, %v353_v6  ;;  %v359_v9 = vld [vmem:[#allocation5 + $0x160] sm:$0xff]  ;;  %v362_v10 = vld [vmem:[#allocation5 + $0x178] sm:$0xff]  ;;  %v299_v29 = vld [vmem:[%s297_s9] sm:$0x1] }
  0x98   : > { %2162 = vmatprep.subr.bf16.mxu0 %v2161_v27  ;;  %v2199_v11 = vpack.c.bf16 %v362_v10, %v359_v9  ;;  %v1874_v12 = vld [vmem:[#allocation8] ss:$0 sm:$0xff]  ;;  %v1875_v13 = vld [vmem:[#allocation8 + $0x1] ss:$0 sm:$0xff]  ;;  %v1876_v24 = vld [vmem:[#allocation8 + $0x2] ss:$0 sm:$0xff]  ;;  %v857_v34 = vrot.slane %v299_v29, %v846_v31 }
  0x99   : > { %vm840_vm2 = vcmp.ge.f32.partialorder %v299_v29, 0.0 }
  0x9a   : > { %2182 = vmatpush3.bf16.msra.mxu1 %v2181_v56 }
  0x9b   : > { %2164 = vmatpush1.bf16.msra.mxu0 %v2163_v32  ;;  %2183 = vmatprep.subr.bf16.mxu1 %v2558_v53  ;;  %v1885_v32 = vsel %vm840_vm2, 1.0, %v2556_v0 }
  0x9c   : > { %2166 = vmatprep.subr.bf16.mxu0 %v2165_v33  ;;  %v847_v33 = vrot.slane %v1885_v32, %v846_v31  ;;  %v1200_v31 = vld [vmem:[#allocation7 + $0x8] sm:$0xff]  ;;  %v1201_v32 = vld [vmem:[#allocation7 + $0x10] sm:$0xff] }
  0x9e   : > { %2185 = vmatpush3.bf16.msra.mxu1 %v2184_v59 }
  0x9f   : > { %2168 = vmatpush1.bf16.msra.mxu0 %v2167_v38  ;;  %2186 = vmatprep.subr.bf16.mxu1 %v2558_v53 }
  0xa0   : > { %2170 = vmatprep.subr.bf16.mxu0 %v2169_v39 }
  0xa2   : > { %2188 = vmatpush3.bf16.msra.mxu1 %v2187_v62 }
  0xa3   : > { %2172 = vmatpush1.bf16.msra.mxu0 %v2171_v44  ;;  %2189 = vmatprep.subr.bf16.mxu1 %v2558_v53 }
  0xa4   : > { %2174 = vmatprep.subr.bf16.mxu0 %v2173_v45 }
  0xa6   : > { %2191 = vmatpush3.bf16.msra.mxu1 %v2190_v2 }
  0xa7   : > { %2176 = vmatpush1.bf16.msra.mxu0 %v2175_v48  ;;  %2192 = vmatprep.subr.bf16.mxu1 %v2558_v53 }
  0xa8   : > { %2015 = vmatprep.subr.mxu0 %v2556_v0 }
  0xaa   : > { %428 = vmatmul.mubr.f32.vlgmr.msra.gmra.mrb[0].mxu0 %v2802_v49  ;;  %2194 = vmatpush3.bf16.msra.mxu1 %v2193_v5 }
  0xab   : > { %2017 = vmatprep.mubr.msk.f32.mxu0 %vm2557_vm0, %v2556_v0  ;;  %2195 = vmatprep.subr.bf16.mxu1 %v2558_v53 }
  0xae   : > { %2197 = vmatpush3.bf16.msra.mxu1 %v2196_v8 }
  0xaf   : > { %2198 = vmatprep.subr.bf16.mxu1 %v2558_v53 }
  0xb2   : > { %2200 = vmatpush3.bf16.msra.mxu1 %v2199_v11 }
  0xb3   : > { %2020 = vmatprep.subr.mxu1 %v2556_v0 }
  0xb5   : > { %2013 = vmatmul.mubr.f32.vlgmr.msra.gmra.mrb[0].mxu1 %v2802_v49 }
  0xb6   : > { %2022 = vmatprep.mubr.msk.f32.mxu1 %vm2557_vm0, %v2556_v0 }
 0x17d   : > { %v429_v14 = vpop.f32.mrb[0].mxu0 }
 0x17e   : > { %v508_v15 = vadd.f32 %v1874_v12, %v429_v14  ;;  %v431_v16 = vpop.f32.mrb[1].mxu0 }
 0x17f   : > { %v513_v17 = vadd.f32 %v1875_v13, %v431_v16 }
 0x180   : > { %520 = vrot.lane.b32.xlu1 %v508_v15, %s2559_s24 }
 0x181   : > { %527 = vrot.lane.b32.xlu0 %v513_v17, %s2559_s24  ;;  %2016 = vmatpush3.xpose.msk.msra.mxu0 %vm543_vm1, %v513_v17 }
 0x182   : > { %2025 = vmatprep.subr.mxu0 %v2556_v0 }
 0x184   : > { %531 = vrot.lane.b32.xlu1 %v513_v17, %s2560_s26  ;;  %2018 = vmatmul.mubr.msk.f32.vlgmr.msra.gmra.mrb[2].mxu0 %vm543_vm1, %v508_v15 }
 0x185   : > { %529 = vrot.lane.b32.xlu0 %v513_v17, %s2561_s14  ;;  %2027 = vmatprep.mubr.msk.f32.mxu0 %vm2557_vm0, %v2556_v0 }
 0x188   : > { %524 = vrot.lane.b32.xlu1 %v508_v15, %s2560_s26  ;;  %v500_v25 = vpop.f32.mrb[0].mxu1 }
 0x189   : > { %522 = vrot.lane.b32.xlu0 %v508_v15, %s2561_s14  ;;  %v2848_v26 = vadd.f32 %v1876_v24, %v500_v25  ;;  %v2014_v27 = vpop.f32.mrb[1].mxu1 }
 0x18a   : > { %v1199_v27 = vld [vmem:[#allocation7] sm:$0xff] }
 0x1f2   : > { %v521_v18 = vpop.permute.xlu1 %520 }
 0x1f3   : > { %v528_v19 = vpop.permute.xlu0 %527 }
 0x1f4   : > { %2021 = vmatpush3.xpose.msk.msra.mxu1 %vm543_vm1, %v528_v19 }
 0x1f5   : > { %2030 = vmatprep.subr.mxu1 %v2556_v0 }
 0x1f6   : > { %v532_v20 = vpop.permute.xlu1 %531 }
 0x1f7   : > { %2023 = vmatmul.mubr.msk.f32.vlgmr.msra.gmra.mrb[2].mxu1 %vm543_vm1, %v521_v18  ;;  %v530_v21 = vpop.permute.xlu0 %529 }
 0x1f8   : > { %2026 = vmatpush3.xpose.msk.msra.mxu0 %vm543_vm1, %v530_v21  ;;  %2031 = vmatpush3.xpose.msk.msra.mxu1 %vm543_vm1, %v532_v20 }
 0x1f9   : > { %2032 = vmatprep.mubr.msk.f32.mxu1 %vm2557_vm0, %v2556_v0  ;;  %2035 = vmatprep.subr.mxu0 %v2556_v0 }
 0x1fa   : > { %v525_v22 = vpop.permute.xlu1 %524  ;;  %2040 = vmatprep.subr.mxu1 %v2556_v0 }
 0x1fb   : > { %2033 = vmatmul.mubr.msk.f32.vlgmr.msra.gmra.mrb[4].mxu1 %vm543_vm1, %v525_v22  ;;  %v523_v23 = vpop.permute.xlu0 %522 }
 0x1fc   : > { %2028 = vmatmul.mubr.msk.f32.vlgmr.msra.gmra.mrb[4].mxu0 %vm543_vm1, %v523_v23  ;;  %2042 = vmatprep.mubr.msk.f32.mxu1 %vm2557_vm0, %v2556_v0 }
 0x1fd   : > { %2037 = vmatprep.mubr.msk.f32.mxu0 %vm2557_vm0, %v2556_v0  ;;  %2036 = vmatpush3.msra.mxu0 %v2848_v26 }
 0x1fe   : > { %2045 = vmatprep.subr.mxu0 %v2556_v0 }
 0x257   : > { %v614_v35 = vpop.f32.mrb[2].mxu0 }
 0x258   : > { %v849_v36 = vmul.f32 %v847_v33, %v614_v35  ;;  %v2019_v37 = vpop.f32.mrb[3].mxu0  ;;  %v1202_v35 = vld [vmem:[#allocation7 + $0x18] sm:$0xff] }
 0x25a   : > { %v859_v38 = vadd.f32 %v857_v34, %v849_v36 }
 0x25c   : > { %v863_v39 = vsel %vm543_vm1, %v859_v38, -inf }
 0x25d   : > { %864 = vmax.xlane.f32.xlu0 %v863_v39 }
 0x2ca   : > { %v688_v40 = vpop.f32.mrb[2].mxu1 }
 0x2cb   : > { %v850_v41 = vmul.f32 %v847_v33, %v688_v40  ;;  %v2024_v42 = vpop.f32.mrb[3].mxu1 }
 0x2cd   : > { %v860_v43 = vadd.f32 %v857_v34, %v850_v41 }
 0x2ce   : > { %v836_v44 = vpop.f32.mrb[4].mxu1 }
 0x2cf   : > { %v762_v45 = vpop.f32.mrb[4].mxu0  ;;  %v2034_v46 = vpop.f32.mrb[5].mxu1  ;;  %v866_v47 = vsel %vm543_vm1, %v860_v43, -inf  ;;  %v852_v48 = vmul.f32 %v847_v33, %v836_v44  ;;  %v1891_v44 = vld [vmem:[#allocation8 + $0x3] ss:$0 sm:$0xff] }
 0x2d0   : > { %v851_v50 = vmul.f32 %v847_v33, %v762_v45  ;;  %867 = vmax.xlane.f32.xlu1 %v866_v47  ;;  %v2029_v51 = vpop.f32.mrb[5].mxu0 }
 0x2d1   : > { %v862_v55 = vadd.f32 %v857_v34, %v852_v48 }
 0x2d2   : > { %v861_v52 = vadd.f32 %v857_v34, %v851_v50 }
 0x2d3   : > { %v872_v56 = vsel %vm543_vm1, %v862_v55, -inf }
 0x2d4   : > { %v869_v54 = vsel %vm543_vm1, %v861_v52, -inf }
 0x2d5   : > { %870 = vmax.xlane.f32.xlu0 %v869_v54 }
 0x2d9   : > { %873 = vmax.xlane.f32.xlu0 %v872_v56 }
 0x2e1   : > { %534 = vrot.lane.b32.xlu1 %v2848_v26, %s2559_s24  ;;  %s2472_s24 = scalar_lea.vmem %s2933_s11, 128 }
 0x2e2   : > { %p2473_p3 = scmp.ne.s32.totalorder %s2933_s11, %s2472_s24 }
 0x2e4   : > { %p2474_p7 = pnand %p2473_p3, %p2735_p5 }
 0x2e6   : > { %p2475_p12 = pneg %p2474_p7 }
 0x2ea   : > { %v865_v57 = vpop.xlane.xlu0 %864 }
 0x2eb   : > { %v875_v58 = vsub.f32 %v859_v38, %v865_v57 }
 0x2ed   : > { %v879_v59 = vmul.f32 1.442695, %v875_v58  ;;  %v1527_v58 = vld [vmem:[#allocation7 + $0x80] sm:$0xff] }
 0x2ef   : > { %2336 = vpow2.f32 %v879_v59  ;;  %v1528_v59 = vld [vmem:[#allocation7 + $0x88] sm:$0xff] }
 0x2f9   : > { %v2337_v60 = vpop.eup %2336 }
 0x2fa   : > { %v887_v61 = vsel %vm543_vm1, %v2337_v60, 0.0 }
 0x305   : > { %888 = vadd.xlane.f32.xlu1 %v887_v61  ;;  %v2202_v61 = vpack.c.bf16 %v1528_v59, %v1527_v58  ;;  %v1897_v59 = vld [vmem:[#allocation8 + $0x6] ss:$0 sm:$0xff] }
 0x35d   : > { %v868_v62 = vpop.xlane.xlu1 %867 }
 0x35e   : > { %v876_v63 = vsub.f32 %v860_v43, %v868_v62  ;;  %v1530_v62 = vld [vmem:[#allocation7 + $0x98] sm:$0xff] }
 0x360   : > { %v881_v1 = vmul.f32 1.442695, %v876_v63 }
 0x361   : > { %v535_v2 = vpop.permute.xlu1 %534 }
 0x362   : > { %2338 = vpow2.f32 %v881_v1  ;;  %2041 = vmatpush3.msra.mxu1 %v535_v2  ;;  %v871_v3 = vpop.xlane.xlu0 %870  ;;  %v1531_v1 = vld [vmem:[#allocation7 + $0xa0] sm:$0xff]  ;;  %v1532_v2 = vld [vmem:[#allocation7 + $0xa8] sm:$0xff] }
 0x363   : > { %v877_v4 = vsub.f32 %v861_v52, %v871_v3  ;;  %2050 = vmatprep.subr.mxu1 %v2556_v0  ;;  %v2208_v3 = vpack.c.bf16 %v1532_v2, %v1531_v1 }
 0x365   : > { %v883_v5 = vmul.f32 1.442695, %v877_v4 }
 0x366   : > { %v874_v6 = vpop.xlane.xlu0 %873 }
 0x367   : > { %2340 = vpow2.f32 %v883_v5  ;;  %v878_v7 = vsub.f32 %v862_v55, %v874_v6 }
 0x369   : > { %v885_v8 = vmul.f32 1.442695, %v878_v7 }
 0x36b   : > { %2342 = vpow2.f32 %v885_v8 }
 0x36c   : > { %v2339_v9 = vpop.eup %2338 }
 0x36d   : > { %v890_v10 = vsel %vm543_vm1, %v2339_v9, 0.0 }
 0x36e   : > { %891 = vadd.xlane.f32.xlu0 %v890_v10  ;;  %v1533_v10 = vld [vmem:[#allocation7 + $0xb0] sm:$0xff] }
 0x371   : > { %v2341_v11 = vpop.eup %2340 }
 0x372   : > { %v893_v12 = vsel %vm543_vm1, %v2341_v11, 0.0 }
 0x373   : > { %894 = vadd.xlane.f32.xlu1 %v893_v12 }
 0x375   : > { %v2343_v13 = vpop.eup %2342 }
 0x376   : > { %v896_v14 = vsel %vm543_vm1, %v2343_v13, 0.0 }
 0x377   : > { %897 = vadd.xlane.f32.xlu0 %v896_v14  ;;  %v1536_v14 = vld [vmem:[#allocation7 + $0xc8] sm:$0xff] }
 0x384   : > { %540 = vrot.lane.b32.xlu1 %v2848_v26, %s2560_s26  ;;  %s2478_s26 = scalar_lea.vmem %s2477_s17, 256 }
 0x385   : > { %p2480_p1 = scmp.lt.s32.totalorder %s2478_s26, %s2472_s24 }
 0x387   : > { %p2481_p4 = por %p2480_p1, %p2479_p2 }
 0x389   : > { %p2482_p0 = pnand %p2481_p4, %p2475_p12 }
 0x38d   : > { %537 = vrot.lane.b32.xlu0 %v2848_v26, %s2561_s14 }
 0x392   : > { %v889_v15 = vpop.xlane.xlu1 %888 }
 0x393   : > { %2344 = vrcp.f32 %v889_v15 }
 0x39d   : > { %v2345_v16 = vpop.eup %2344 }
 0x39e   : > { %v900_v17 = vmul.f32 %v2345_v16, %v2337_v60  ;;  %v1529_v60 = vld [vmem:[#allocation7 + $0x90] sm:$0xff]  ;;  %v1538_v16 = vld [vmem:[#allocation7 + $0xd8] sm:$0xff] }
 0x39f   : > { %v2205_v63 = vpack.c.bf16 %v1530_v62, %v1529_v60 }
 0x3a0   : > { %2038 = vmatmul.mubr.msk.f32.vlgmr.msra.gmra.mrb[6].mxu0 %vm543_vm1, %v900_v17 }
 0x3a1   : > { %2047 = vmatprep.mubr.msk.f32.mxu0 %vm2557_vm0, %v2556_v0 }
 0x3fb   : > { %v892_v18 = vpop.xlane.xlu0 %891 }
 0x3fc   : > { %2346 = vrcp.f32 %v892_v18  ;;  %v1540_v18 = vld [vmem:[#allocation7 + $0xe8] sm:$0xff] }
 0x400   : > { %v895_v19 = vpop.xlane.xlu1 %894 }
 0x401   : > { %2348 = vrcp.f32 %v895_v19 }
 0x404   : > { %v898_v20 = vpop.xlane.xlu0 %897  ;;  %v541_v24 = vpop.permute.xlu1 %540 }
 0x405   : > { %2350 = vrcp.f32 %v898_v20  ;;  %v1541_v20 = vld [vmem:[#allocation7 + $0xf0] sm:$0xff] }
 0x406   : > { %v2347_v21 = vpop.eup %2346 }
 0x407   : > { %v902_v22 = vmul.f32 %v2347_v21, %v2339_v9  ;;  %v1542_v21 = vld [vmem:[#allocation7 + $0xf8] sm:$0xff] }
 0x408   : > { %v538_v23 = vpop.permute.xlu0 %537 }
 0x409   : > { %2043 = vmatmul.mubr.msk.f32.vlgmr.msra.gmra.mrb[6].mxu1 %vm543_vm1, %v902_v22  ;;  %2046 = vmatpush3.msra.mxu0 %v538_v23  ;;  %v2223_v22 = vpack.c.bf16 %v1542_v21, %v1541_v20  ;;  %v1623_v23 = vld [vmem:[#allocation7 + $0x100] sm:$0xff] }
 0x40a   : > { %2051 = vmatpush3.msra.mxu1 %v541_v24  ;;  %2052 = vmatprep.mubr.msk.f32.mxu1 %vm2557_vm0, %v2556_v0  ;;  %v1624_v24 = vld [vmem:[#allocation7 + $0x108] sm:$0xff] }
 0x40b   : > { %v2349_v25 = vpop.eup %2348  ;;  %2055 = vmatprep.subr.mxu0 %v2556_v0  ;;  %2060 = vmatprep.subr.mxu1 %v2556_v0 }
 0x40c   : > { %v904_v26 = vmul.f32 %v2349_v25, %v2341_v11  ;;  %v1534_v11 = vld [vmem:[#allocation7 + $0xb8] sm:$0xff]  ;;  %v1625_v25 = vld [vmem:[#allocation7 + $0x110] sm:$0xff] }
 0x40d   : > { %v2211_v12 = vpack.c.bf16 %v1534_v11, %v1533_v10 }
 0x40e   : > { %2048 = vmatmul.mubr.msk.f32.vlgmr.msra.gmra.mrb[8].mxu0 %vm543_vm1, %v904_v26  ;;  %v2226_v26 = vpack.c.bf16 %v1624_v24, %v1623_v23 }
 0x40f   : > { %v2351_v29 = vpop.eup %2350  ;;  %2056 = vmatpush3.msra.mxu0 %v1199_v27  ;;  %2057 = vmatprep.mubr.msk.f32.mxu0 %vm2557_vm0, %v2556_v0  ;;  %v1626_v27 = vld [vmem:[#allocation7 + $0x118] sm:$0xff] }
 0x410   : > { %v906_v30 = vmul.f32 %v2351_v29, %v2343_v13  ;;  %2065 = vmatprep.subr.mxu0 %v2556_v0  ;;  %v1535_v13 = vld [vmem:[#allocation7 + $0xc0] sm:$0xff]  ;;  %v2229_v29 = vpack.c.bf16 %v1626_v27, %v1625_v25 }
 0x411   : > { %v2214_v15 = vpack.c.bf16 %v1536_v14, %v1535_v13 }
 0x412   : > { %2053 = vmatmul.mubr.msk.f32.vlgmr.msra.gmra.mrb[8].mxu1 %vm543_vm1, %v906_v30  ;;  %v1627_v30 = vld [vmem:[#allocation7 + $0x120] sm:$0xff] }
 0x413   : > { %2062 = vmatprep.mubr.msk.f32.mxu1 %vm2557_vm0, %v2556_v0  ;;  %2061 = vmatpush3.msra.mxu1 %v1200_v31  ;;  %v1628_v31 = vld [vmem:[#allocation7 + $0x128] sm:$0xff] }
 0x414   : > { %2070 = vmatprep.subr.mxu1 %v2556_v0 }
 0x473   : > { %v976_v33 = vpop.f32.mrb[6].mxu0 }
 0x474   : > { %v2039_v34 = vpop.f32.mrb[7].mxu0  ;;  %2058 = vmatmul.mubr.msk.f32.vlgmr.msra.gmra.mrb[10].mxu0 %vm543_vm1, %v976_v33 }
 0x475   : > { %2066 = vmatpush3.msra.mxu0 %v1201_v32  ;;  %2067 = vmatprep.mubr.msk.f32.mxu0 %vm2557_vm0, %v2556_v0  ;;  %v2232_v32 = vpack.c.bf16 %v1628_v31, %v1627_v30 }
 0x476   : > { %2201 = vmatprep.subr.bf16.mxu0 %v2558_v53 }
 0x4dc   : > { %v1049_v36 = vpop.f32.mrb[6].mxu1 }
 0x4dd   : > { %v2044_v37 = vpop.f32.mrb[7].mxu1  ;;  %2063 = vmatmul.mubr.msk.f32.vlgmr.msra.gmra.mrb[10].mxu1 %vm543_vm1, %v1049_v36 }
 0x4de   : > { %2071 = vmatpush3.msra.mxu1 %v1202_v35  ;;  %2072 = vmatprep.mubr.msk.f32.mxu1 %vm2557_vm0, %v2556_v0  ;;  %v1895_v37 = vld [vmem:[#allocation8 + $0x4] ss:$0 sm:$0xff] }
 0x4df   : > { %2225 = vmatprep.subr.bf16.mxu1 %v2558_v53 }
 0x4e1   : > { %v1122_v38 = vpop.f32.mrb[8].mxu0 }
 0x4e2   : > { %v2049_v39 = vpop.f32.mrb[9].mxu0  ;;  %2068 = vmatmul.mubr.msk.f32.vlgmr.msra.gmra.mrb[12].mxu0 %vm543_vm1, %v1122_v38 }
 0x4e3   : > { %2107 = vmatprep.mubr.msk.f32.mxu0 %vm2557_vm0, %v2556_v0  ;;  %2203 = vmatpush3.bf16.msra.mxu0 %v2202_v61  ;;  %v1896_v39 = vld [vmem:[#allocation8 + $0x5] ss:$0 sm:$0xff] }
 0x4e4   : > { %2204 = vmatprep.subr.bf16.mxu0 %v2558_v53 }
 0x4e5   : > { %v1195_v40 = vpop.f32.mrb[8].mxu1 }
 0x4e6   : > { %v2054_v41 = vpop.f32.mrb[9].mxu1  ;;  %2073 = vmatmul.mubr.msk.f32.vlgmr.msra.gmra.mrb[12].mxu1 %vm543_vm1, %v1195_v40 }
 0x4e7   : > { %2142 = vmatprep.mubr.msk.f32.mxu1 %vm2557_vm0, %v2556_v0  ;;  %2206 = vmatpush3.bf16.msra.mxu0 %v2205_v63 }
 0x4e8   : > { %2207 = vmatprep.subr.bf16.mxu0 %v2558_v53  ;;  %2227 = vmatpush3.bf16.msra.mxu1 %v2226_v26 }
 0x4e9   : > { %2228 = vmatprep.subr.bf16.mxu1 %v2558_v53 }
 0x4eb   : > { %2209 = vmatpush3.bf16.msra.mxu0 %v2208_v3 }
 0x4ec   : > { %2210 = vmatprep.subr.bf16.mxu0 %v2558_v53  ;;  %2230 = vmatpush3.bf16.msra.mxu1 %v2229_v29 }
 0x4ed   : > { %2231 = vmatprep.subr.bf16.mxu1 %v2558_v53 }
 0x4ef   : > { %2212 = vmatpush3.bf16.msra.mxu0 %v2211_v12 }
 0x4f0   : > { %2213 = vmatprep.subr.bf16.mxu0 %v2558_v53  ;;  %2233 = vmatpush3.bf16.msra.mxu1 %v2232_v32 }
 0x4f1   : > { %2234 = vmatprep.subr.bf16.mxu1 %v2558_v53 }
 0x4f3   : > { %2215 = vmatpush3.bf16.msra.mxu0 %v2214_v15 }
 0x4f4   : > { %2216 = vmatprep.subr.bf16.mxu0 %v2558_v53 }
 0x547   : > { %v1272_v42 = vpop.f32.mrb[10].mxu0 }
 0x548   : > { %v2059_v43 = vpop.f32.mrb[11].mxu0  ;;  %v1280_v45 = vadd.f32 %v1891_v44, %v1272_v42  ;;  %v1629_v42 = vld [vmem:[#allocation7 + $0x130] sm:$0xff] }
 0x549   : > { %v1630_v43 = vld [vmem:[#allocation7 + $0x138] sm:$0xff] }
 0x54a   : > { %v2235_v44 = vpack.c.bf16 %v1630_v43, %v1629_v42 }
 0x54c   : > { %2236 = vmatpush3.bf16.msra.mxu1 %v2235_v44 }
 0x54d   : > { %2237 = vmatprep.subr.bf16.mxu1 %v2558_v53 }
 0x5b0   : > { %v1350_v46 = vpop.f32.mrb[10].mxu1 }
 0x5b1   : > { %v1354_v47 = vadd.f32 %v1350_v46, %v1280_v45  ;;  %v2064_v48 = vpop.f32.mrb[11].mxu1  ;;  %v1631_v45 = vld [vmem:[#allocation7 + $0x140] sm:$0xff]  ;;  %v1632_v46 = vld [vmem:[#allocation7 + $0x148] sm:$0xff] }
 0x5b2   : > { %v1633_v48 = vld [vmem:[#allocation7 + $0x150] sm:$0xff] }
 0x5b5   : > { %v1424_v50 = vpop.f32.mrb[12].mxu0 }
 0x5b6   : > { %v1428_v51 = vadd.f32 %v1424_v50, %v1354_v47  ;;  %v2069_v52 = vpop.f32.mrb[13].mxu0  ;;  %v2238_v47 = vpack.c.bf16 %v1632_v46, %v1631_v45  ;;  %v1634_v50 = vld [vmem:[#allocation7 + $0x158] sm:$0xff] }
 0x5b7   : > { %v1635_v52 = vld [vmem:[#allocation7 + $0x160] sm:$0xff] }
 0x5b8   : > { %2239 = vmatpush3.bf16.msra.mxu1 %v2238_v47 }
 0x5b9   : > { %v1498_v54 = vpop.f32.mrb[12].mxu1  ;;  %2240 = vmatprep.subr.bf16.mxu1 %v2558_v53 }
 0x5ba   : > { %v1502_v55 = vadd.f32 %v1498_v54, %v1428_v51  ;;  %v2074_v56 = vpop.f32.mrb[13].mxu1  ;;  %v2241_v51 = vpack.c.bf16 %v1634_v50, %v1633_v48  ;;  %v1636_v54 = vld [vmem:[#allocation7 + $0x168] sm:$0xff] }
 0x5bb   : > { %v1637_v56 = vld [vmem:[#allocation7 + $0x170] sm:$0xff] }
 0x5bc   : > { %v1503_v57 = vadd.f32 %v1502_v55, %v2802_v49  ;;  %v311_v49 = vand.u32 127, %v310_v28  ;;  %v1537_v28 = vld [vmem:[#allocation7 + $0xd0] sm:$0xff]  ;;  %2242 = vmatpush3.bf16.msra.mxu1 %v2241_v51  ;;  %v2244_v55 = vpack.c.bf16 %v1636_v54, %v1635_v52 }
 0x5bd   : > { %v2217_v17 = vpack.c.bf16 %v1538_v16, %v1537_v28  ;;  %2243 = vmatprep.subr.bf16.mxu1 %v2558_v53 }
 0x5be   : > { %1504 = vadd.xlane.f32.xlu1 %v1503_v57  ;;  %vm312_vm3 = vcmp.lt.s32.totalorder %v311_v49, 32 }
 0x5bf   : > { %v2910_v6 = vsel %vm312_vm3, 1.0, %v2556_v0  ;;  %v1539_v0 = vld [vmem:[#allocation7 + $0xe0] sm:$0xff]  ;;  %2218 = vmatpush3.bf16.msra.mxu0 %v2217_v17  ;;  %v1899_v17 = vld [vmem:[#allocation8 + $0x8] ss:$0 sm:$0xff] }
 0x5c0   : > { %v2220_v19 = vpack.c.bf16 %v1540_v18, %v1539_v0  ;;  %2219 = vmatprep.subr.bf16.mxu0 %v2558_v53  ;;  %2245 = vmatpush3.bf16.msra.mxu1 %v2244_v55  ;;  %v1900_v18 = vld [vmem:[#allocation8 + $0x9] ss:$0 sm:$0xff] }
 0x5c1   : > { %2246 = vmatprep.subr.bf16.mxu1 %v2558_v53 }
 0x5c3   : > { %2221 = vmatpush3.bf16.msra.mxu0 %v2220_v19 }
 0x5c4   : > { %2222 = vmatprep.subr.bf16.mxu0 %v2558_v53 }
 0x5c7   : > { %2224 = vmatpush3.bf16.msra.mxu0 %v2223_v22 }
 0x64b   : > { %v1505_v4 = vpop.xlane.xlu1 %1504 }
 0x64c   : > { %v1506_v5 = vmul.f32 0.03125, %v1505_v4  ;;  %v1898_v4 = vld [vmem:[#allocation8 + $0x7] ss:$0 sm:$0xff] }
 0x64e   : > { %v1507_v7 = vsub.f32 %v1503_v57, %v1506_v5  ;;  %v1638_v57 = vld [vmem:[#allocation7 + $0x178] sm:$0xff] }
 0x64f   : > { %v2247_v58 = vpack.c.bf16 %v1638_v57, %v1637_v56 }
 0x650   : > { %v1508_v8 = vmul.f32 %v2910_v6, %v1507_v7 }
 0x651   : > { %2248 = vmatpush3.bf16.msra.mxu1 %v2247_v58 }
 0x652   : > { %v1509_v9 = vmul.f32 %v1508_v8, %v1508_v8 }
 0x654   : > { %1510 = vadd.xlane.f32.xlu0 %v1509_v9 }
 0x6e1   : > { %v1511_v33 = vpop.xlane.xlu0 %1510 }
 0x6e2   : > { %v1512_v34 = vmul.f32 0.03125, %v1511_v33 }
 0x6e4   : > { %v1513_v35 = vadd.f32 1e-12, %v1512_v34 }
 0x6e6   : > { %2352 = vrsqrt.f32 %v1513_v35 }
 0x6f0   : > { %v2353_v36 = vpop.eup %2352 }
 0x6f1   : > { %v1515_v38 = vmul.f32 %v2353_v36, %v1508_v8 }
 0x6f3   : > { %v1520_v40 = vmul.f32 %v1895_v37, %v1515_v38 }
 0x6f5   : > { %v1525_v41 = vadd.f32 %v1896_v39, %v1520_v40 }
 0x6f7   : > { %2108 = vmatmul.mubr.f32.vlgmr.msra.gmra.mrb[14].mxu0 %v1525_v41 }
 0x7ca   : > { %v1613_v60 = vpop.f32.mrb[14].mxu0 }
 0x7cb   : > { %v1614_v61 = vadd.f32 %v1897_v59, %v1613_v60  ;;  %v2109_v62 = vpop.f32.mrb[15].mxu0 }
 0x7cd   : > { %v1618_v63 = vmul.f32 0.70710677, %v1614_v61  ;;  %v1617_v2 = vmul.f32 0.5, %v1614_v61 }
 0x7cf   : > { %2354 = verf.f32 %v1618_v63 }
 0x7d9   : > { %v2355_v1 = vpop.eup %2354 }
 0x7da   : > { %v1620_v3 = vadd.f32 1.0, %v2355_v1 }
 0x7dc   : > { %v1621_v49 = vmul.f32 %v1620_v3, %v1617_v2 }
 0x7de   : > { %2143 = vmatmul.mubr.f32.vlgmr.msra.gmra.mrb[14].mxu1 %v1621_v49 }
 0x8b1   : > { %v1709_v5 = vpop.f32.mrb[14].mxu1 }
 0x8b2   : > { %v1710_v7 = vadd.f32 %v1898_v4, %v1709_v5  ;;  %v2144_v8 = vpop.f32.mrb[15].mxu1 }
 0x8b4   : > { %v1713_v53 = vadd.f32 %v1710_v7, %v1525_v41 }
 0x8b6   : > { %1714 = vadd.xlane.f32.xlu0 %v1713_v53 }
 0x943   : > { %v1715_v9 = vpop.xlane.xlu0 %1714 }
 0x944   : > { %v1716_v10 = vmul.f32 0.03125, %v1715_v9 }
 0x946   : > { %v1717_v11 = vsub.f32 %v1713_v53, %v1716_v10 }
 0x948   : > { %v1718_v12 = vmul.f32 %v2910_v6, %v1717_v11 }
 0x94a   : > { %v1719_v13 = vmul.f32 %v1718_v12, %v1718_v12 }
 0x94c   : > { %1720 = vadd.xlane.f32.xlu1 %v1719_v13 }
 0x9d9   : > { %v1721_v14 = vpop.xlane.xlu1 %1720 }
 0x9da   : > { %v1722_v28 = vmul.f32 0.03125, %v1721_v14 }
 0x9dc   : > { %v1723_v15 = vadd.f32 1e-12, %v1722_v28 }
 0x9de   : > { %2356 = vrsqrt.f32 %v1723_v15 }
 0x9e8   : > { %v2357_v16 = vpop.eup %2356 }
 0x9e9   : > { %v1725_v0 = vmul.f32 %v2357_v16, %v1718_v12 }
 0x9eb   : > { %v1730_v19 = vmul.f32 %v1899_v17, %v1725_v0 }
 0x9ed   : > { %v1735_v20 = vadd.f32 %v1900_v18, %v1730_v19 }
 0x9ef   : > { %1736 = vst [vmem:[%s294_s8] sm:$0xff] %v1735_v20 }
 0x9f0   : > { %2485 = shalt.err (!%p2482_p0)
}
 0x9f1   : > { %s2486_s16 = scalar_lea.hbm %s2931_s12, 128  ;;  %s2490_s28 = scalar_lea.hbm %s2980_s5, 256 }
 0x9f2   : > { %p2487_p9 = scmp.ne.s32.totalorder %s2931_s12, %s2486_s16  ;;  %p2491_p13 = scmp.lt.u32.totalorder %s2931_s12, %s2980_s5 }
 0x9f3   : > { %p2492_p6 = scmp.lt.u32.totalorder %s2490_s28, %s2486_s16  ;;  %p2494_p3 = scmp.lt.u32.totalorder %s2486_s16, %s2931_s12 }
 0x9f4   : > { %p2488_p11 = pnand %p2487_p9, %p2735_p5 }
 0x9f5   : > { %p2493_p10 = por %p2492_p6, %p2491_p13 }
 0x9f6   : > { %p2489_p8 = pneg %p2488_p11 }
 0x9f7   : > { %p2495_p7 = por %p2494_p3, %p2493_p10 }
 0x9f9   : > { %p2496_p12 = pnand %p2495_p7, %p2489_p8 }
 0x9fb   : > { %2499 = shalt.err (!%p2496_p12)
}
 0x9fc   : > { %2263 = dma.vmem_to_hbm [thread:$0]  (%p2735_p5), %s2933_s11, 128, %s2931_s12, %s1738_s23  }
 0x9fd PF: > { %s1763_s10 = sand.u32 1, %s2534_s18   ;;  %p2998_p2 = scmp.ne.s32.totalorder %s2985_s25, 0 }
 0x9fe   : > { %p2999_p1 = scmp.ge.s32.totalorder %s2546_s21, 2  ;;  %s1764_s8 = scalar_lea.sflag [#allocation4], %s1763_s10 }
 0xa00   : > { %p2280_p4 = pnand %p2999_p1, %p2998_p2 }
 0xa02   : > { %2529 = dma.done.wait (!%p2280_p4), %s1764_s8, 128  }
 0xa03   : > { %2531 = vsyncadd (!%p2280_p4), %s1764_s8, 4294967168  ;;  %p20_p0 = scmp.ge.s32.totalorder %s2703_s30, 4   ;;  %s3000_s18 = smov %s2538_s19 }
 0xa04   : > { %s3001_s19 = smov %s2542_s20  ;;  %s3002_s20 = smov %s2731_s29 }
 0xa05   : > { %s3003_s21 = smov %s2703_s30  ;;  %22 = sbr.rel (!%p20_p0) target bundleno = 7 (0x7), region = 102 }
 0xa0c   :  { %1769 = vsyncpa [#allocation3], 1 }
 0xa0d   :  { %1771 = vsyncpa [#allocation3 + $0x1], 1 }
 0xa0e   :  { %1772 = vsyncpa [#allocation6], 1 }
 0xa0f   :  { %1773 = vsyncpa [#allocation9], 1 }
 0xa10   :  { %1774 = vsyncpa [#allocation4], 1 }
 0xa11   :  { %1776 = vsyncpa [#allocation4 + $0x1], 1 }

</bundles_post_ra>
